<compile_context>
chip_gen: v5e
topology: v5e:2x2
jax: 0.10.0
libtpu: 0.0.40
codegen_flags: <defaults>
</compile_context>

<pallas_src>
import jax
import jax.numpy as jnp
from jax.experimental import pallas as pl
from jax.experimental.pallas import tpu as pltpu

IN_FEATURES = 28 * 28   # 784 (divisible by 8 -> sublane-aligned as w1's leading dim)
HIDDEN = 512
OUT_FEATURES = 10
OUT_PAD = 128           # lane-dense output width (sliced back to 10 in the wrapper)
DESIRED_TILE_B = 1024   # multiple of 256 (v6e/v7x MXU) and 128 (v5e MXU)


def _round_up(n, m):
    return ((n + m - 1) // m) * m


def _choose_tile_b(b_pad, desired=DESIRED_TILE_B):
    """Big tiles to amortize per-step overhead, but keep >=2 grid steps for v7x's 2 TCs."""
    tile = min(desired, b_pad)
    if b_pad >= 512:  # enough rows to keep both v7x TensorCores busy
        tile = min(tile, _round_up(pl.cdiv(b_pad, 2), 256))
    return max(8, tile)


def mlp_kernel(x_ref, w1_ref, b1_ref, w2_ref, b2_ref, w3_ref, b3_ref, o_ref):
    # In-kernel flatten-cast: x arrives f32, cast to bf16 right before the MXU.
    x = x_ref[...].astype(jnp.bfloat16)
    # Layer 1: Linear(784 -> 512) + ReLU  (bf16 MXU inputs, f32 accumulation)
    h = jnp.dot(x, w1_ref[...], preferred_element_type=jnp.float32)
    h = jnp.maximum(h + b1_ref[...], 0.0).astype(jnp.bfloat16)
    # Layer 2: Linear(512 -> 512) + ReLU
    h = jnp.dot(h, w2_ref[...], preferred_element_type=jnp.float32)
    h = jnp.maximum(h + b2_ref[...], 0.0).astype(jnp.bfloat16)
    # Layer 3: Linear(512 -> 10, padded to 128) + ReLU (spec's stack ends with ReLU)
    h = jnp.dot(h, w3_ref[...], preferred_element_type=jnp.float32)
    o_ref[...] = jnp.maximum(h + b3_ref[...], 0.0).astype(o_ref.dtype)


def neural_network_forward(x, kernel_params, tile_b=None):
    """x: [B, 28, 28] float32 -> logits [B, 10] float32."""
    w1, b1, w2, b2, w3, b3 = kernel_params
    B = x.shape[0]

    # nn.Flatten(): reshape is free; keep f32 (cast happens inside the kernel).
    x_flat = x.reshape(B, IN_FEATURES)
    # Only pad to the next multiple of 8 (sublane alignment) when needed; the grid uses
    # cdiv so no full tile-alignment pad is ever materialized.
    b_pad = _round_up(B, 8)
    if b_pad != B:
        x_flat = jnp.pad(x_flat, ((0, b_pad - B), (0, 0)))

    if tile_b is None:
        tile_b = _choose_tile_b(b_pad)
    tile_b = max(8, min(tile_b, b_pad))
    grid = (pl.cdiv(b_pad, tile_b),)

    def resident(shape):
        # Constant block index keeps the operand VMEM-resident across grid steps.
        return pl.BlockSpec(shape, lambda i: (0, 0))

    flops = 2 * b_pad * (IN_FEATURES * HIDDEN + HIDDEN * HIDDEN + HIDDEN * OUT_PAD)
    bytes_accessed = (
        b_pad * IN_FEATURES * 4                       # x (f32)
        + (w1.size + w2.size + w3.size) * 2           # bf16 weights
        + (b1.size + b2.size + b3.size) * 4           # f32 biases
        + b_pad * OUT_PAD * 2                         # bf16 logits block
    )

    out = pl.pallas_call(
        mlp_kernel,
        out_shape=jax.ShapeDtypeStruct((b_pad, OUT_PAD), jnp.bfloat16),
        grid=grid,
        in_specs=[
            # x: tiled over batch; last dim == full array dim so no 128 padding needed.
            pl.BlockSpec((tile_b, IN_FEATURES), lambda i: (i, 0)),
            resident((IN_FEATURES, HIDDEN)),   # w1
            resident((1, HIDDEN)),             # b1
            resident((HIDDEN, HIDDEN)),        # w2
            resident((1, HIDDEN)),             # b2
            resident((HIDDEN, OUT_PAD)),       # w3
            resident((1, OUT_PAD)),            # b3
        ],
        out_specs=pl.BlockSpec((tile_b, OUT_PAD), lambda i: (i, 0)),
        compiler_params=pltpu.CompilerParams(
            dimension_semantics=("parallel",)),
        cost_estimate=pl.CostEstimate(
            flops=flops, transcendentals=0, bytes_accessed=bytes_accessed),
    )(x_flat, w1, b1, w2, b2, w3, b3)

    return out[:B, :OUT_FEATURES].astype(jnp.float32)


def init_params(key):
    """f32, unpadded params matching PyTorch nn.Linear init (weights stored [in, out])."""
    def linear(key, fan_in, fan_out):
        kw, kb = jax.random.split(key)
        bound = 1.0 / jnp.sqrt(fan_in)
        w = jax.random.uniform(kw, (fan_in, fan_out), jnp.float32, -bound, bound)
        b = jax.random.uniform(kb, (1, fan_out), jnp.float32, -bound, bound)
        return w, b

    k1, k2, k3 = jax.random.split(key, 3)
    w1, b1 = linear(k1, IN_FEATURES, HIDDEN)
    w2, b2 = linear(k2, HIDDEN, HIDDEN)
    w3, b3 = linear(k3, HIDDEN, OUT_FEATURES)
    return (w1, b1, w2, b2, w3, b3)


def prepare_kernel_params(params):
    """Weights bf16 (MXU inputs), biases f32; only the last layer is lane-padded."""
    w1, b1, w2, b2, w3, b3 = params
    w1p = w1.astype(jnp.bfloat16)                                          # [784, 512]
    w2p = w2.astype(jnp.bfloat16)                                          # [512, 512]
    w3p = jnp.pad(w3, ((0, 0), (0, OUT_PAD - OUT_FEATURES))).astype(jnp.bfloat16)
    b3p = jnp.pad(b3, ((0, 0), (0, OUT_PAD - OUT_FEATURES)))
    return (w1p, b1, w2p, b2, w3p, b3p)


def reference_forward(x, params):
    """Pure-JAX f32 reference of the PyTorch module (incl. the trailing ReLU)."""
    w1, b1, w2, b2, w3, b3 = params
    h = x.reshape(x.shape[0], IN_FEATURES)
    h = jnp.maximum(h @ w1 + b1, 0.0)
    h = jnp.maximum(h @ w2 + b2, 0.0)
    h = jnp.maximum(h @ w3 + b3, 0.0)
    return h


if __name__ == "__main__":
    key = jax.random.PRNGKey(0)
    k_x, k_p = jax.random.split(key)

    B = 2
    x = jax.random.uniform(k_x, (B, 28, 28), jnp.float32)  # like torch.rand(N, 28, 28)
    params = init_params(k_p)
    kernel_params = prepare_kernel_params(params)

    logits = neural_network_forward(x, kernel_params)
    logits = jax.block_until_ready(logits)

    ref = reference_forward(x, params)
    assert logits.shape == (B, OUT_FEATURES)
    # bf16 weights/activations/output with f32 accumulation: small quantization error.
    assert jnp.allclose(logits, ref, atol=5e-2, rtol=5e-2), (
        "max abs err = %f" % float(jnp.max(jnp.abs(logits - ref))))

    print("KERNEL_OK")
</pallas_src>

<mosaic_0001>
module attributes {stable_mosaic.version = 11 : i64} {
  func.func @mlp_kernel(%arg0: i32, %arg1: memref<8x784xf32, #tpu.memory_space<vmem>>, %arg2: memref<784x512xbf16, #tpu.memory_space<vmem>>, %arg3: memref<1x512xf32, #tpu.memory_space<vmem>>, %arg4: memref<512x512xbf16, #tpu.memory_space<vmem>>, %arg5: memref<1x512xf32, #tpu.memory_space<vmem>>, %arg6: memref<512x128xbf16, #tpu.memory_space<vmem>>, %arg7: memref<1x128xf32, #tpu.memory_space<vmem>>, %arg8: memref<8x128xbf16, #tpu.memory_space<vmem>>) attributes {dimension_semantics = [#tpu.dimension_semantics<parallel>], iteration_bounds = array<i64: 1>, scalar_prefetch = 0 : i64, scratch_operands = 0 : i64, tpu.core_type = #tpu.core_type<tc>, window_params = [{transform_indices = @transform_0, window_bounds = array<i64: 8, 784>}, {pipeline_mode = #tpu.pipeline_mode<synchronous>, transform_indices = @transform_1, window_bounds = array<i64: 784, 512>}, {pipeline_mode = #tpu.pipeline_mode<synchronous>, transform_indices = @transform_2, window_bounds = array<i64: 1, 512>}, {pipeline_mode = #tpu.pipeline_mode<synchronous>, transform_indices = @transform_3, window_bounds = array<i64: 512, 512>}, {pipeline_mode = #tpu.pipeline_mode<synchronous>, transform_indices = @transform_4, window_bounds = array<i64: 1, 512>}, {pipeline_mode = #tpu.pipeline_mode<synchronous>, transform_indices = @transform_5, window_bounds = array<i64: 512, 128>}, {pipeline_mode = #tpu.pipeline_mode<synchronous>, transform_indices = @transform_6, window_bounds = array<i64: 1, 128>}, {transform_indices = @transform_7, window_bounds = array<i64: 8, 128>}]} {
    %c0 = arith.constant 0 : index
    %c0_0 = arith.constant 0 : index
    %0 = vector.load %arg1[%c0, %c0_0] : memref<8x784xf32, #tpu.memory_space<vmem>>, vector<8x784xf32>
    %1 = arith.truncf %0 : vector<8x784xf32> to vector<8x784xbf16>
    %c0_1 = arith.constant 0 : index
    %c0_2 = arith.constant 0 : index
    %2 = vector.load %arg2[%c0_1, %c0_2] : memref<784x512xbf16, #tpu.memory_space<vmem>>, vector<784x512xbf16>
    %cst = arith.constant dense<0.000000e+00> : vector<8x512xf32>
    %3 = tpu.matmul %1, %2, %cst {dimension_numbers = #tpu.dot_dimension_numbers<[1], [0], [0], [1], [0, 0, 1, 1], [], []>} : vector<8x784xbf16>, vector<784x512xbf16>, vector<8x512xf32> -> vector<8x512xf32>
    %c0_3 = arith.constant 0 : index
    %c0_4 = arith.constant 0 : index
    %4 = vector.load %arg3[%c0_3, %c0_4] : memref<1x512xf32, #tpu.memory_space<vmem>>, vector<1x512xf32>
    %5 = vector.broadcast %4 : vector<1x512xf32> to vector<8x512xf32>
    %6 = arith.addf %3, %5 : vector<8x512xf32>
    %cst_5 = arith.constant 0.000000e+00 : f32
    %7 = vector.broadcast %cst_5 : f32 to vector<8x512xf32>
    %8 = arith.maximumf %6, %7 : vector<8x512xf32>
    %9 = arith.truncf %8 : vector<8x512xf32> to vector<8x512xbf16>
    %c0_6 = arith.constant 0 : index
    %c0_7 = arith.constant 0 : index
    %10 = vector.load %arg4[%c0_6, %c0_7] : memref<512x512xbf16, #tpu.memory_space<vmem>>, vector<512x512xbf16>
    %cst_8 = arith.constant dense<0.000000e+00> : vector<8x512xf32>
    %11 = tpu.matmul %9, %10, %cst_8 {dimension_numbers = #tpu.dot_dimension_numbers<[1], [0], [0], [1], [0, 0, 1, 1], [], []>} : vector<8x512xbf16>, vector<512x512xbf16>, vector<8x512xf32> -> vector<8x512xf32>
    %c0_9 = arith.constant 0 : index
    %c0_10 = arith.constant 0 : index
    %12 = vector.load %arg5[%c0_9, %c0_10] : memref<1x512xf32, #tpu.memory_space<vmem>>, vector<1x512xf32>
    %13 = vector.broadcast %12 : vector<1x512xf32> to vector<8x512xf32>
    %14 = arith.addf %11, %13 : vector<8x512xf32>
    %cst_11 = arith.constant 0.000000e+00 : f32
    %15 = vector.broadcast %cst_11 : f32 to vector<8x512xf32>
    %16 = arith.maximumf %14, %15 : vector<8x512xf32>
    %17 = arith.truncf %16 : vector<8x512xf32> to vector<8x512xbf16>
    %c0_12 = arith.constant 0 : index
    %c0_13 = arith.constant 0 : index
    %18 = vector.load %arg6[%c0_12, %c0_13] : memref<512x128xbf16, #tpu.memory_space<vmem>>, vector<512x128xbf16>
    %cst_14 = arith.constant dense<0.000000e+00> : vector<8x128xf32>
    %19 = tpu.matmul %17, %18, %cst_14 {dimension_numbers = #tpu.dot_dimension_numbers<[1], [0], [0], [1], [0, 0, 1, 1], [], []>} : vector<8x512xbf16>, vector<512x128xbf16>, vector<8x128xf32> -> vector<8x128xf32>
    %c0_15 = arith.constant 0 : index
    %c0_16 = arith.constant 0 : index
    %20 = vector.load %arg7[%c0_15, %c0_16] : memref<1x128xf32, #tpu.memory_space<vmem>>, vector<1x128xf32>
    %21 = vector.broadcast %20 : vector<1x128xf32> to vector<8x128xf32>
    %22 = arith.addf %19, %21 : vector<8x128xf32>
    %cst_17 = arith.constant 0.000000e+00 : f32
    %23 = vector.broadcast %cst_17 : f32 to vector<8x128xf32>
    %24 = arith.maximumf %22, %23 : vector<8x128xf32>
    %25 = arith.truncf %24 : vector<8x128xf32> to vector<8x128xbf16>
    %c0_18 = arith.constant 0 : index
    %c0_19 = arith.constant 0 : index
    %26 = vector.load %arg8[%c0_18, %c0_19] : memref<8x128xbf16, #tpu.memory_space<vmem>>, vector<8x128xbf16>
    tpu.vector_store %arg8[%c0_18, %c0_19], %25 {strides = array<i32>} : memref<8x128xbf16, #tpu.memory_space<vmem>>, vector<8x128xbf16>,
    return
  }
  func.func @transform_0(%arg0: i32) -> (i32, i32) {
    %c0_i32 = arith.constant 0 : i32
    %c0_i32_0 = arith.constant 0 : i32
    return %arg0, %c0_i32 : i32, i32
  }
  func.func @transform_1(%arg0: i32) -> (i32, i32) {
    %c0_i32 = arith.constant 0 : i32
    %c0_i32_0 = arith.constant 0 : i32
    %c0_i32_1 = arith.constant 0 : i32
    return %c0_i32, %c0_i32_0 : i32, i32
  }
  func.func @transform_2(%arg0: i32) -> (i32, i32) {
    %c0_i32 = arith.constant 0 : i32
    %c0_i32_0 = arith.constant 0 : i32
    %c0_i32_1 = arith.constant 0 : i32
    return %c0_i32, %c0_i32_0 : i32, i32
  }
  func.func @transform_3(%arg0: i32) -> (i32, i32) {
    %c0_i32 = arith.constant 0 : i32
    %c0_i32_0 = arith.constant 0 : i32
    %c0_i32_1 = arith.constant 0 : i32
    return %c0_i32, %c0_i32_0 : i32, i32
  }
  func.func @transform_4(%arg0: i32) -> (i32, i32) {
    %c0_i32 = arith.constant 0 : i32
    %c0_i32_0 = arith.constant 0 : i32
    %c0_i32_1 = arith.constant 0 : i32
    return %c0_i32, %c0_i32_0 : i32, i32
  }
  func.func @transform_5(%arg0: i32) -> (i32, i32) {
    %c0_i32 = arith.constant 0 : i32
    %c0_i32_0 = arith.constant 0 : i32
    %c0_i32_1 = arith.constant 0 : i32
    return %c0_i32, %c0_i32_0 : i32, i32
  }
  func.func @transform_6(%arg0: i32) -> (i32, i32) {
    %c0_i32 = arith.constant 0 : i32
    %c0_i32_0 = arith.constant 0 : i32
    %c0_i32_1 = arith.constant 0 : i32
    return %c0_i32, %c0_i32_0 : i32, i32
  }
  func.func @transform_7(%arg0: i32) -> (i32, i32) {
    %c0_i32 = arith.constant 0 : i32
    %c0_i32_0 = arith.constant 0 : i32
    return %arg0, %c0_i32 : i32, i32
  }
}

</mosaic_0001>

<bundles_post_ra>
// kernel: tpu_custom_call.1
= control target key start
LH: loop header
LB: loop body
LE: loop exit
PB: predicated region body
PF: predicated region fallthrough
CT: control target
= control target key end

     0   :  { %12 = vsyncpa [#allocation3], 0  ;;  %s5203_s0 = inlined_call_operand.hbm [shape: f32[8,784], index: 0, kind: input, shape index: {}]   ;;  %s5204_s1 = inlined_call_operand.hbm [shape: bf16[784,512], index: 1, kind: input, shape index: {}]   ;;  %s5205_s2 = inlined_call_operand.hbm [shape: f32[1,512], index: 2, kind: input, shape index: {}]   ;;  %s5206_s3 = inlined_call_operand.hbm [shape: bf16[512,512], index: 3, kind: input, shape index: {}]   ;;  %s5207_s4 = inlined_call_operand.hbm [shape: f32[1,512], index: 4, kind: input, shape index: {}]   ;;  %s5208_s5 = inlined_call_operand.hbm [shape: bf16[512,128], index: 5, kind: input, shape index: {}]   ;;  %s5209_s6 = inlined_call_operand.vmem [shape: f32[1,128], index: 6, kind: input, shape index: {}]   ;;  %s5210_s7 = inlined_call_operand.hbm [shape: bf16[8,128], index: 7, kind: output, shape index: {}]  }
   0x1   :  { %13 = vsyncpa [#allocation6], 0 }
   0x2   :  { %14 = vsyncpa [#allocation9], 0 }
   0x3   :  { %15 = vsyncpa [#allocation12], 0  ;;  %s32_s26 = sshll.u32 %s5204_s1, 4  ;;  %s33_s26 = int_to_ptr.hbm [resolvable:$true] %s32_s26 }
   0x4   :  { %16 = vsyncpa [#allocation4], 0  ;;  %s4995_s27 = smov [#allocation5]   ;;  %s56_s8 = sshll.u32 %s5206_s3, 4  ;;  %s57_s8 = int_to_ptr.hbm [resolvable:$true] %s56_s8 }
   0x5   :  { %s34_s28 = sshll.u32 %s4995_s27, 4  ;;  %s4996_s9 = smov 256   ;;  %s35_s28 = int_to_ptr.vmem [resolvable:$true] %s34_s28 }
   0x6   :  { %s4997_s10 = smov 16   ;;  %s4998_s11 = smov [#allocation8]  }
   0x7   :  { %40 = dma.hbm_to_vmem [thread:$0]  %s33_s26, 25088, %s35_s28, [#allocation6], %s4996_s9, %s4996_s9, %s4997_s10  }
   0x8   :  { %s58_s12 = sshll.u32 %s4998_s11, 4  ;;  %s22_s15 = sshll.u32 %s5203_s0, 4  ;;  %s59_s12 = int_to_ptr.vmem [resolvable:$true] %s58_s12  ;;  %s23_s15 = int_to_ptr.hbm [resolvable:$true] %s22_s15 }
   0x9   :  { %64 = dma.hbm_to_vmem [thread:$0]  %s57_s8, 16384, %s59_s12, [#allocation9], %s4996_s9, %s4996_s9, %s4997_s10  }
   0xa   :  { %s46_s17 = sshll.u32 %s5205_s2, 4  ;;  %s4999_s18 = smov [#allocation2]   ;;  %s47_s17 = int_to_ptr.hbm [resolvable:$true] %s46_s17 }
   0xb   :  { %s24_s19 = sshll.u32 %s4999_s18, 4  ;;  %s5000_s3 = smov [#allocation7]   ;;  %s25_s19 = int_to_ptr.vmem [resolvable:$true] %s24_s19 }
   0xc   :  { %27 = dma.hbm_to_vmem [thread:$0]  %s23_s15, 896, %s25_s19, [#allocation3]  }
   0xd   :  { %s48_s20 = sshll.u32 %s5000_s3, 4  ;;  %s70_s23 = sshll.u32 %s5207_s4, 4  ;;  %s49_s20 = int_to_ptr.vmem [resolvable:$true] %s48_s20  ;;  %s71_s23 = int_to_ptr.hbm [resolvable:$true] %s70_s23 }
   0xe   :  { %51 = dma.hbm_to_vmem [thread:$0]  %s47_s17, 64, %s49_s20, [#allocation6]  }
   0xf   :  { %s80_s25 = sshll.u32 %s5208_s5, 4  ;;  %s5001_s26 = smov [#allocation10]   ;;  %s81_s25 = int_to_ptr.hbm [resolvable:$true] %s80_s25 }
  0x10   :  { %s72_s2 = sshll.u32 %s5001_s26, 4  ;;  %s5002_s27 = smov [#allocation11]   ;;  %s73_s2 = int_to_ptr.vmem [resolvable:$true] %s72_s2 }
  0x11   :  { %75 = dma.hbm_to_vmem [thread:$0]  %s71_s23, 64, %s73_s2, [#allocation9]  }
  0x12   :  { %s82_s28 = sshll.u32 %s5002_s27, 4  ;;  %s5003_s29 = smov 64   ;;  %s83_s28 = int_to_ptr.vmem [resolvable:$true] %s82_s28 }
  0x13   :  { %s5004_s30 = smov 4  }
  0x14   :  { %88 = dma.hbm_to_vmem [thread:$0]  %s81_s25, 4096, %s83_s28, [#allocation12], %s5003_s29, %s5003_s29, %s5004_s30  }
  0x15   :  { %4985 = dma.done.wait [#allocation3], 896  }
  0x16   :  { %4986 = vsyncadd [#allocation3], 4294966400 }
  0x17   :  { %4987 = dma.done.wait [#allocation6], 25152  }
  0x18   :  { %4988 = vsyncadd [#allocation6], 4294942144 }
  0x19   :  { %4989 = dma.done.wait [#allocation9], 16448  }
  0x1a   :  { %4990 = vsyncadd [#allocation9], 4294950848 }
  0x1b   :  { %4991 = dma.done.wait [#allocation12], 4096  }
  0x1c   :  { %4992 = vsyncadd [#allocation12], 4294963200  ;;  %v3135_v0 = vld [vmem:[#allocation5 + $0xe0] sm:$0xf]  ;;  %v4479_v1 = vld [vmem:[#allocation5 + $0xec] sm:$0xf0] }
  0x1d   :  { %v3263_v2 = vld [vmem:[#allocation5 + $0x1e0] sm:$0xf]  ;;  %v3136_v3 = vor.u32 %v4479_v1, %v3135_v0  ;;  %v4511_v4 = vld [vmem:[#allocation5 + $0x1ec] sm:$0xf0]  ;;  %vm1316_vm0 = vcmask 130048   ;;  %s5005_s8 = smov [#allocation13]  }
  0x1e   :  { %v3391_v5 = vld [vmem:[#allocation5 + $0x2e0] sm:$0xf]  ;;  %v4543_v6 = vld [vmem:[#allocation5 + $0x2ec] sm:$0xf0]  ;;  %v3264_v7 = vor.u32 %v4511_v4, %v3263_v2  ;;  %s3006_s9 = sshll.u32 %s5005_s8, 4  ;;  %s3008_s12 = sshll.u32 %s5210_s7, 4  ;;  %s3007_s9 = int_to_ptr.vmem [resolvable:$true] %s3006_s9  ;;  %s3009_s12 = int_to_ptr.hbm [resolvable:$true] %s3008_s12 }
  0x1f   :  { %v3392_v8 = vor.u32 %v4543_v6, %v3391_v5  ;;  %v3519_v9 = vld [vmem:[#allocation5 + $0x3e0] sm:$0xf]  ;;  %v4575_v10 = vld [vmem:[#allocation5 + $0x3ec] sm:$0xf0]  ;;  %1320 = vmatpush.bf16.msra.mxu0 %v3136_v3 }
  0x20   :  { %v3119_v11 = vld [vmem:[#allocation5 + $0xc0] sm:$0xf]  ;;  %v3520_v12 = vor.u32 %v4575_v10, %v3519_v9  ;;  %v4475_v13 = vld [vmem:[#allocation5 + $0xcc] sm:$0xf0]  ;;  %1333 = vmatpush.bf16.msra.mxu1 %v3264_v7 }
  0x21   :  { %v3247_v14 = vld [vmem:[#allocation5 + $0x1c0] sm:$0xf]  ;;  %v4507_v15 = vld [vmem:[#allocation5 + $0x1cc] sm:$0xf0]  ;;  %1346 = vmatpush.bf16.msra.mxu2 %v3392_v8  ;;  %v3120_v16 = vor.u32 %v4475_v13, %v3119_v11 }
  0x22   :  { %v3248_v17 = vor.u32 %v4507_v15, %v3247_v14  ;;  %v3375_v18 = vld [vmem:[#allocation5 + $0x2c0] sm:$0xf]  ;;  %v4539_v19 = vld [vmem:[#allocation5 + $0x2cc] sm:$0xf0]  ;;  %1359 = vmatpush.bf16.msra.mxu3 %v3520_v12 }
  0x23   :  { %v3503_v20 = vld [vmem:[#allocation5 + $0x3c0] sm:$0xf]  ;;  %v3376_v21 = vor.u32 %v4539_v19, %v3375_v18  ;;  %v4571_v22 = vld [vmem:[#allocation5 + $0x3cc] sm:$0xf0]  ;;  %1321 = vmatpush.bf16.msra.mxu0 %v3120_v16 }
  0x24   :  { %v3103_v23 = vld [vmem:[#allocation5 + $0xa0] sm:$0xf]  ;;  %v4471_v24 = vld [vmem:[#allocation5 + $0xac] sm:$0xf0]  ;;  %v3504_v25 = vor.u32 %v4571_v22, %v3503_v20  ;;  %1334 = vmatpush.bf16.msra.mxu1 %v3248_v17 }
  0x25   :  { %v3231_v26 = vld [vmem:[#allocation5 + $0x1a0] sm:$0xf]  ;;  %v4503_v27 = vld [vmem:[#allocation5 + $0x1ac] sm:$0xf0]  ;;  %v3104_v29 = vor.u32 %v4471_v24, %v3103_v23  ;;  %1347 = vmatpush.bf16.msra.mxu2 %v3376_v21 }
  0x26   :  { %v3359_v28 = vld [vmem:[#allocation5 + $0x2a0] sm:$0xf]  ;;  %v4535_v30 = vld [vmem:[#allocation5 + $0x2ac] sm:$0xf0]  ;;  %v3232_v33 = vor.u32 %v4503_v27, %v3231_v26  ;;  %1360 = vmatpush.bf16.msra.mxu3 %v3504_v25 }
  0x27   :  { %v3487_v31 = vld [vmem:[#allocation5 + $0x3a0] sm:$0xf]  ;;  %v4567_v32 = vld [vmem:[#allocation5 + $0x3ac] sm:$0xf0]  ;;  %v3360_v34 = vor.u32 %v4535_v30, %v3359_v28  ;;  %1322 = vmatpush.bf16.msra.mxu0 %v3104_v29 }
  0x28   :  { %v3087_v35 = vld [vmem:[#allocation5 + $0x80] sm:$0xf]  ;;  %v4467_v36 = vld [vmem:[#allocation5 + $0x8c] sm:$0xf0]  ;;  %v3488_v38 = vor.u32 %v4567_v32, %v3487_v31  ;;  %1335 = vmatpush.bf16.msra.mxu1 %v3232_v33  ;;  %v4477_v33 = vld [vmem:[#allocation5 + $0xe4] sm:$0xf] }
  0x29   :  { %v3215_v37 = vld [vmem:[#allocation5 + $0x180] sm:$0xf]  ;;  %v4499_v39 = vld [vmem:[#allocation5 + $0x18c] sm:$0xf0]  ;;  %v3088_v44 = vor.u32 %v4467_v36, %v3087_v35  ;;  %1348 = vmatpush.bf16.msra.mxu2 %v3360_v34  ;;  %v3137_v34 = vld [vmem:[#allocation5 + $0xf0] sm:$0xf0] }
  0x2a   :  { %v3343_v40 = vld [vmem:[#allocation5 + $0x280] sm:$0xf]  ;;  %v4531_v41 = vld [vmem:[#allocation5 + $0x28c] sm:$0xf0]  ;;  %v3216_v45 = vor.u32 %v4499_v39, %v3215_v37  ;;  %1361 = vmatpush.bf16.msra.mxu3 %v3488_v38  ;;  %v118_v35 = vld [vmem:[#allocation2 + $0x10] sm:$0xff] }
  0x2b   :  { %v3471_v42 = vld [vmem:[#allocation5 + $0x380] sm:$0xf]  ;;  %v4563_v43 = vld [vmem:[#allocation5 + $0x38c] sm:$0xf0]  ;;  %v3344_v46 = vor.u32 %v4531_v41, %v3343_v40  ;;  %1323 = vmatpush.bf16.msra.mxu0 %v3088_v44  ;;  %v116_v40 = vld [vmem:[#allocation2] sm:$0xff] }
  0x2c   :  { %v3071_v47 = vld [vmem:[#allocation5 + $0x60] sm:$0xf]  ;;  %v4463_v48 = vld [vmem:[#allocation5 + $0x6c] sm:$0xf0]  ;;  %v3472_v50 = vor.u32 %v4563_v43, %v3471_v42  ;;  %1336 = vmatpush.bf16.msra.mxu1 %v3216_v45  ;;  %v4509_v43 = vld [vmem:[#allocation5 + $0x1e4] sm:$0xf] }
  0x2d   :  { %v3199_v49 = vld [vmem:[#allocation5 + $0x160] sm:$0xf]  ;;  %v4495_v51 = vld [vmem:[#allocation5 + $0x16c] sm:$0xf0]  ;;  %v3072_v56 = vor.u32 %v4463_v48, %v3071_v47  ;;  %1349 = vmatpush.bf16.msra.mxu2 %v3344_v46  ;;  %v3265_v44 = vld [vmem:[#allocation5 + $0x1f0] sm:$0xf0]  ;;  %v3140_v47 = vor.u32 %v4477_v33, %v3137_v34 }
  0x2e   :  { %v3327_v52 = vld [vmem:[#allocation5 + $0x260] sm:$0xf]  ;;  %v4527_v53 = vld [vmem:[#allocation5 + $0x26c] sm:$0xf0]  ;;  %v3200_v57 = vor.u32 %v4495_v51, %v3199_v49  ;;  %1362 = vmatpush.bf16.msra.mxu3 %v3472_v50  ;;  %v5064_v51 = vpack.c.bf16 %v118_v35, %v118_v35  ;;  %v4493_v35 = vld [vmem:[#allocation5 + $0x164] sm:$0xf] }
  0x2f   :  { %v3455_v54 = vld [vmem:[#allocation5 + $0x360] sm:$0xf]  ;;  %v4559_v55 = vld [vmem:[#allocation5 + $0x36c] sm:$0xf0]  ;;  %v3328_v58 = vor.u32 %v4527_v53, %v3327_v52  ;;  %1324 = vmatpush.bf16.msra.mxu0 %v3072_v56  ;;  %v4473_v53 = vld [vmem:[#allocation5 + $0xc4] sm:$0xf] }
  0x30   :  { %v3055_v59 = vld [vmem:[#allocation5 + $0x40] sm:$0xf]  ;;  %v4459_v60 = vld [vmem:[#allocation5 + $0x4c] sm:$0xf0]  ;;  %v3456_v62 = vor.u32 %v4559_v55, %v3455_v54  ;;  %1337 = vmatpush.bf16.msra.mxu1 %v3200_v57  ;;  %v3121_v54 = vld [vmem:[#allocation5 + $0xd0] sm:$0xf0]  ;;  %v5066_v55 = vpack.c.bf16 %v116_v40, %v116_v40 }
  0x31   :  { %v3183_v61 = vld [vmem:[#allocation5 + $0x140] sm:$0xf]  ;;  %v4491_v63 = vld [vmem:[#allocation5 + $0x14c] sm:$0xf0]  ;;  %v3056_v4 = vor.u32 %v4459_v60, %v3055_v59  ;;  %1350 = vmatpush.bf16.msra.mxu2 %v3328_v58  ;;  %v3268_v59 = vor.u32 %v4509_v43, %v3265_v44  ;;  %v4457_v43 = vld [vmem:[#allocation5 + $0x44] sm:$0xf] }
  0x32   :  { %v3311_v0 = vld [vmem:[#allocation5 + $0x240] sm:$0xf]  ;;  %v4523_v1 = vld [vmem:[#allocation5 + $0x24c] sm:$0xf0]  ;;  %v3184_v5 = vor.u32 %v4491_v63, %v3183_v61  ;;  %1363 = vmatpush.bf16.msra.mxu3 %v3456_v62  ;;  %v4505_v61 = vld [vmem:[#allocation5 + $0x1c4] sm:$0xf] }
  0x33   :  { %v3439_v2 = vld [vmem:[#allocation5 + $0x340] sm:$0xf]  ;;  %v4555_v3 = vld [vmem:[#allocation5 + $0x34c] sm:$0xf0]  ;;  %v3312_v6 = vor.u32 %v4523_v1, %v3311_v0  ;;  %1325 = vmatpush.bf16.msra.mxu0 %v3056_v4  ;;  %v3249_v62 = vld [vmem:[#allocation5 + $0x1d0] sm:$0xf0]  ;;  %v3124_v0 = vor.u32 %v4473_v53, %v3121_v54 }
  0x34   :  { %v3039_v7 = vld [vmem:[#allocation5 + $0x20] sm:$0xf]  ;;  %v4455_v8 = vld [vmem:[#allocation5 + $0x2c] sm:$0xf0]  ;;  %v3440_v10 = vor.u32 %v4555_v3, %v3439_v2  ;;  %1338 = vmatpush.bf16.msra.mxu1 %v3184_v5  ;;  %v4469_v5 = vld [vmem:[#allocation5 + $0xa4] sm:$0xf] }
  0x35   :  { %v3167_v9 = vld [vmem:[#allocation5 + $0x120] sm:$0xf]  ;;  %v4487_v11 = vld [vmem:[#allocation5 + $0x12c] sm:$0xf0]  ;;  %v3040_v16 = vor.u32 %v4455_v8, %v3039_v7  ;;  %1351 = vmatpush.bf16.msra.mxu2 %v3312_v6  ;;  %v3105_v6 = vld [vmem:[#allocation5 + $0xb0] sm:$0xf0]  ;;  %v3252_v8 = vor.u32 %v4505_v61, %v3249_v62 }
  0x36   :  { %v3295_v12 = vld [vmem:[#allocation5 + $0x220] sm:$0xf]  ;;  %v4519_v13 = vld [vmem:[#allocation5 + $0x22c] sm:$0xf0]  ;;  %v3168_v20 = vor.u32 %v4487_v11, %v3167_v9  ;;  %1364 = vmatpush.bf16.msra.mxu3 %v3440_v10  ;;  %v4501_v10 = vld [vmem:[#allocation5 + $0x1a4] sm:$0xf] }
  0x37   :  { %v3423_v14 = vld [vmem:[#allocation5 + $0x320] sm:$0xf]  ;;  %v4551_v15 = vld [vmem:[#allocation5 + $0x32c] sm:$0xf0]  ;;  %v3296_v21 = vor.u32 %v4519_v13, %v3295_v12  ;;  %1326 = vmatpush.bf16.msra.mxu0 %v3040_v16  ;;  %v3233_v11 = vld [vmem:[#allocation5 + $0x1b0] sm:$0xf0]  ;;  %v3108_v13 = vor.u32 %v4469_v5, %v3105_v6 }
  0x38   :  { %v3023_v17 = vld [vmem:[#allocation5] sm:$0xf]  ;;  %v4451_v18 = vld [vmem:[#allocation5 + $0xc] sm:$0xf0]  ;;  %v3424_v25 = vor.u32 %v4551_v15, %v3423_v14  ;;  %1339 = vmatpush.bf16.msra.mxu1 %v3168_v20  ;;  %v3236_v20 = vor.u32 %v4501_v10, %v3233_v11  ;;  %v3057_v44 = vld [vmem:[#allocation5 + $0x50] sm:$0xf0] }
  0x39   :  { %v3151_v19 = vld [vmem:[#allocation5 + $0x100] sm:$0xf]  ;;  %v4483_v22 = vld [vmem:[#allocation5 + $0x10c] sm:$0xf0]  ;;  %v3024_v32 = vor.u32 %v4451_v18, %v3023_v17  ;;  %1352 = vmatpush.bf16.msra.mxu2 %v3296_v21  ;;  %v4465_v18 = vld [vmem:[#allocation5 + $0x84] sm:$0xf] }
  0x3a   :  { %v3279_v23 = vld [vmem:[#allocation5 + $0x200] sm:$0xf]  ;;  %v4515_v24 = vld [vmem:[#allocation5 + $0x20c] sm:$0xf0]  ;;  %v3152_v36 = vor.u32 %v4483_v22, %v3151_v19  ;;  %1365 = vmatpush.bf16.msra.mxu3 %v3424_v25  ;;  %v3089_v19 = vld [vmem:[#allocation5 + $0x90] sm:$0xf0] }
  0x3b   :  { %v3407_v26 = vld [vmem:[#allocation5 + $0x300] sm:$0xf]  ;;  %v4547_v27 = vld [vmem:[#allocation5 + $0x30c] sm:$0xf0]  ;;  %v3280_v37 = vor.u32 %v4515_v24, %v3279_v23  ;;  %1327 = vmatpush.bf16.msra.mxu0 %v3024_v32  ;;  %v4497_v22 = vld [vmem:[#allocation5 + $0x184] sm:$0xf]  ;;  %v3092_v25 = vor.u32 %v4465_v18, %v3089_v19 }
  0x3c   :  { %v3647_v28 = vld [vmem:[#allocation5 + $0x4e0] sm:$0xf]  ;;  %v4607_v29 = vld [vmem:[#allocation5 + $0x4ec] sm:$0xf0]  ;;  %v3408_v41 = vor.u32 %v4547_v27, %v3407_v26  ;;  %1340 = vmatpush.bf16.msra.mxu1 %v3152_v36  ;;  %v3217_v23 = vld [vmem:[#allocation5 + $0x190] sm:$0xf0] }
  0x3d   :  { %v3775_v30 = vld [vmem:[#allocation5 + $0x5e0] sm:$0xf]  ;;  %v4639_v31 = vld [vmem:[#allocation5 + $0x5ec] sm:$0xf0]  ;;  %v3648_v42 = vor.u32 %v4607_v29, %v3647_v28  ;;  %1353 = vmatpush.bf16.msra.mxu2 %v3280_v37  ;;  %v122_v32 = vld [vmem:[#allocation2 + $0x30] sm:$0xff]  ;;  %v3220_v33 = vor.u32 %v4497_v22, %v3217_v23 }
  0x3e   :  { %v3791_v38 = vld [vmem:[#allocation5 + $0x600] sm:$0xf]  ;;  %v4643_v39 = vld [vmem:[#allocation5 + $0x60c] sm:$0xf0]  ;;  %v3776_v46 = vor.u32 %v4639_v31, %v3775_v30  ;;  %1366 = vmatpush.bf16.msra.mxu3 %v3408_v41  ;;  %1328 = vmatmul.bf16.vlgmr.msra.gmra.mxu0 %v5066_v55  ;;  %v4461_v30 = vld [vmem:[#allocation5 + $0x64] sm:$0xf] }
  0x3f   :  { %v119_v45 = vld [vmem:[#allocation2 + $0x18] sm:$0xff]  ;;  %v4603_v49 = vld [vmem:[#allocation5 + $0x4cc] sm:$0xf0]  ;;  %v3792_v56 = vor.u32 %v4643_v39, %v3791_v38  ;;  %1372 = vmatpush.bf16.msrb.mxu0 %v3648_v42  ;;  %v3073_v31 = vld [vmem:[#allocation5 + $0x70] sm:$0xf0] }
  0x40   :  { %v3631_v48 = vld [vmem:[#allocation5 + $0x4c0] sm:$0xf]  ;;  %v4635_v52 = vld [vmem:[#allocation5 + $0x5cc] sm:$0xf0]  ;;  %v5068_v57 = vpack.c.bf16 %v119_v45, %v119_v45  ;;  %1385 = vmatpush.bf16.msrb.mxu1 %v3776_v46  ;;  %1354 = vmatmul.bf16.vlgmr.msra.gmra.mxu2 %v5064_v51  ;;  %v3201_v36 = vld [vmem:[#allocation5 + $0x170] sm:$0xf0]  ;;  %v3076_v38 = vor.u32 %v4461_v30, %v3073_v31  ;;  %v5076_v45 = vpack.c.bf16 %v122_v32, %v122_v32 }
  0x41   :  { %v3759_v50 = vld [vmem:[#allocation5 + $0x5c0] sm:$0xf]  ;;  %v117_v58 = vld [vmem:[#allocation2 + $0x8] sm:$0xff]  ;;  %v3632_v60 = vor.u32 %v4603_v49, %v3631_v48  ;;  %1405 = vmatpush.bf16.msrb.mxu2 %v3792_v56  ;;  %v3204_v46 = vor.u32 %v4493_v35, %v3201_v36  ;;  %v4489_v48 = vld [vmem:[#allocation5 + $0x144] sm:$0xf] }
  0x42   :  { %1411 = vmatpush.bf16.msrb.mxu3 %v3140_v47  ;;  %v3760_v63 = vor.u32 %v4635_v52, %v3759_v50  ;;  %v3615_v1 = vld [vmem:[#allocation5 + $0x4a0] sm:$0xf]  ;;  %v4599_v2 = vld [vmem:[#allocation5 + $0x4ac] sm:$0xf0]  ;;  %v5072_v7 = vpack.c.bf16 %v117_v58, %v117_v58  ;;  %v3185_v49 = vld [vmem:[#allocation5 + $0x150] sm:$0xf0]  ;;  %v3060_v52 = vor.u32 %v4457_v43, %v3057_v44 }
  0x43   :  { %v3743_v3 = vld [vmem:[#allocation5 + $0x5a0] sm:$0xf]  ;;  %v4631_v4 = vld [vmem:[#allocation5 + $0x5ac] sm:$0xf0]  ;;  %1367 = vmatmul.bf16.vlgmr.msra.gmra.mxu3 %v5068_v57  ;;  %1373 = vmatpush.bf16.msrb.mxu0 %v3632_v60  ;;  %v3616_v9 = vor.u32 %v4599_v2, %v3615_v1  ;;  %v3041_v60 = vld [vmem:[#allocation5 + $0x30] sm:$0xf0]  ;;  %v3188_v61 = vor.u32 %v4489_v48, %v3185_v49 }
  0x44   :  { %1386 = vmatpush.bf16.msrb.mxu1 %v3760_v63  ;;  %v3744_v12 = vor.u32 %v4631_v4, %v3743_v3  ;;  %v3599_v14 = vld [vmem:[#allocation5 + $0x480] sm:$0xf]  ;;  %v4595_v15 = vld [vmem:[#allocation5 + $0x48c] sm:$0xf0]  ;;  %v4485_v63 = vld [vmem:[#allocation5 + $0x124] sm:$0xf] }
  0x45   :  { %1424 = vmatpush.bf16.msra.mxu2 %v3268_v59  ;;  %v3727_v16 = vld [vmem:[#allocation5 + $0x580] sm:$0xf]  ;;  %1341 = vmatmul.bf16.vlgmr.msra.gmra.mxu1 %v5072_v7  ;;  %v4627_v17 = vld [vmem:[#allocation5 + $0x58c] sm:$0xf0]  ;;  %v3600_v21 = vor.u32 %v4595_v15, %v3599_v14  ;;  %v4453_v59 = vld [vmem:[#allocation5 + $0x24] sm:$0xf] }
  0x46   :  { %1412 = vmatpush.bf16.msrb.mxu3 %v3124_v0  ;;  %v3728_v24 = vor.u32 %v4627_v17, %v3727_v16  ;;  %v3583_v26 = vld [vmem:[#allocation5 + $0x460] sm:$0xf]  ;;  %v4591_v27 = vld [vmem:[#allocation5 + $0x46c] sm:$0xf0]  ;;  %v3169_v0 = vld [vmem:[#allocation5 + $0x130] sm:$0xf0]  ;;  %v3044_v3 = vor.u32 %v4453_v59, %v3041_v60 }
  0x47   :  { %1374 = vmatpush.bf16.msrb.mxu0 %v3616_v9  ;;  %v3711_v28 = vld [vmem:[#allocation5 + $0x560] sm:$0xf]  ;;  %v4623_v29 = vld [vmem:[#allocation5 + $0x56c] sm:$0xf0]  ;;  %v3584_v34 = vor.u32 %v4591_v27, %v3583_v26  ;;  %v3025_v9 = vld [vmem:[#allocation5 + $0x10] sm:$0xf0]  ;;  %v3172_v14 = vor.u32 %v4485_v63, %v3169_v0 }
  0x48   :  { %1387 = vmatpush.bf16.msrb.mxu1 %v3744_v12  ;;  %v3712_v37 = vor.u32 %v4623_v29, %v3711_v28  ;;  %v3567_v39 = vld [vmem:[#allocation5 + $0x440] sm:$0xf]  ;;  %v4587_v40 = vld [vmem:[#allocation5 + $0x44c] sm:$0xf0]  ;;  %v4541_v10 = vld [vmem:[#allocation5 + $0x2e4] sm:$0xf] }
  0x49   :  { %1425 = vmatpush.bf16.msra.mxu2 %v3252_v8  ;;  %v3695_v41 = vld [vmem:[#allocation5 + $0x540] sm:$0xf]  ;;  %v4619_v42 = vld [vmem:[#allocation5 + $0x54c] sm:$0xf0]  ;;  %v3568_v47 = vor.u32 %v4587_v40, %v3567_v39  ;;  %v4449_v8 = vld [vmem:[#allocation5 + $0x4] sm:$0xf] }
  0x4a   :  { %1413 = vmatpush.bf16.msrb.mxu3 %v3108_v13  ;;  %v3696_v50 = vor.u32 %v4619_v42, %v3695_v41  ;;  %v3551_v53 = vld [vmem:[#allocation5 + $0x420] sm:$0xf]  ;;  %v4583_v54 = vld [vmem:[#allocation5 + $0x42c] sm:$0xf0]  ;;  %v3393_v11 = vld [vmem:[#allocation5 + $0x2f0] sm:$0xf0] }
  0x4b   :  { %1375 = vmatpush.bf16.msrb.mxu0 %v3600_v21  ;;  %v3679_v56 = vld [vmem:[#allocation5 + $0x520] sm:$0xf]  ;;  %v4615_v58 = vld [vmem:[#allocation5 + $0x52c] sm:$0xf0]  ;;  %v3552_v62 = vor.u32 %v4583_v54, %v3551_v53  ;;  %v4573_v12 = vld [vmem:[#allocation5 + $0x3e4] sm:$0xf] }
  0x4c   :  { %1388 = vmatpush.bf16.msrb.mxu1 %v3728_v24  ;;  %v3535_v1 = vld [vmem:[#allocation5 + $0x400] sm:$0xf]  ;;  %v3680_v2 = vor.u32 %v4615_v58, %v3679_v56  ;;  %v4579_v4 = vld [vmem:[#allocation5 + $0x40c] sm:$0xf0]  ;;  %v3521_v13 = vld [vmem:[#allocation5 + $0x3f0] sm:$0xf0]  ;;  %v3396_v24 = vor.u32 %v4541_v10, %v3393_v11 }
  0x4d   :  { %1426 = vmatpush.bf16.msra.mxu2 %v3236_v20  ;;  %v3663_v5 = vld [vmem:[#allocation5 + $0x500] sm:$0xf]  ;;  %v4611_v6 = vld [vmem:[#allocation5 + $0x50c] sm:$0xf0]  ;;  %v3536_v15 = vor.u32 %v4579_v4, %v3535_v1  ;;  %v4605_v16 = vld [vmem:[#allocation5 + $0x4e4] sm:$0xf]  ;;  %v3028_v20 = vor.u32 %v4449_v8, %v3025_v9 }
  0x4e   :  { %1414 = vmatpush.bf16.msrb.mxu3 %v3092_v25  ;;  %v3649_v17 = vld [vmem:[#allocation5 + $0x4f0] sm:$0xf0]  ;;  %v120_v18 = vld [vmem:[#allocation2 + $0x20] sm:$0xff]  ;;  %v3664_v19 = vor.u32 %v4611_v6, %v3663_v5  ;;  %v4481_v21 = vld [vmem:[#allocation5 + $0x104] sm:$0xf]  ;;  %v3524_v25 = vor.u32 %v4573_v12, %v3521_v13 }
  0x4f   :  { %1376 = vmatpush.bf16.msrb.mxu0 %v3584_v34  ;;  %v3153_v22 = vld [vmem:[#allocation5 + $0x110] sm:$0xf0]  ;;  %v4637_v26 = vld [vmem:[#allocation5 + $0x5e4] sm:$0xf]  ;;  %v3652_v29 = vor.u32 %v4605_v16, %v3649_v17  ;;  %v5080_v30 = vpack.c.bf16 %v120_v18, %v120_v18 }
  0x50   :  { %1389 = vmatpush.bf16.msrb.mxu1 %v3712_v37  ;;  %3805 = vmatmul.msk.bf16.vlgmr.msrb.gmra.mxu2 %vm1316_vm0, %v5076_v45  ;;  %v121_v23 = vld [vmem:[#allocation2 + $0x28] sm:$0xff]  ;;  %v4537_v28 = vld [vmem:[#allocation5 + $0x2c4] sm:$0xf]  ;;  %v3156_v34 = vor.u32 %v4481_v21, %v3153_v22 }
  0x51   :  { %1427 = vmatpush.bf16.msra.mxu2 %v3220_v33  ;;  %v3777_v27 = vld [vmem:[#allocation5 + $0x5f0] sm:$0xf0]  ;;  %v4569_v32 = vld [vmem:[#allocation5 + $0x3c4] sm:$0xf]  ;;  %v5082_v35 = vpack.c.bf16 %v121_v23, %v121_v23 }
  0x52   :  { %1415 = vmatpush.bf16.msrb.mxu3 %v3076_v38  ;;  %v3377_v31 = vld [vmem:[#allocation5 + $0x2d0] sm:$0xf0]  ;;  %v4601_v36 = vld [vmem:[#allocation5 + $0x4c4] sm:$0xf]  ;;  %v3780_v38 = vor.u32 %v4637_v26, %v3777_v27 }
  0x53   :  { %1377 = vmatpush.bf16.msrb.mxu0 %v3568_v47  ;;  %v3505_v33 = vld [vmem:[#allocation5 + $0x3d0] sm:$0xf0]  ;;  %v3380_v39 = vor.u32 %v4537_v28, %v3377_v31  ;;  %v4633_v41 = vld [vmem:[#allocation5 + $0x5c4] sm:$0xf] }
  0x54   :  { %1390 = vmatpush.bf16.msrb.mxu1 %v3696_v50  ;;  %v3633_v37 = vld [vmem:[#allocation5 + $0x4d0] sm:$0xf0]  ;;  %v3508_v40 = vor.u32 %v4569_v32, %v3505_v33  ;;  %v4533_v43 = vld [vmem:[#allocation5 + $0x2a4] sm:$0xf] }
  0x55   :  { %1428 = vmatpush.bf16.msra.mxu2 %v3204_v46  ;;  %v3761_v42 = vld [vmem:[#allocation5 + $0x5d0] sm:$0xf0]  ;;  %v3636_v44 = vor.u32 %v4601_v36, %v3633_v37  ;;  %v4565_v47 = vld [vmem:[#allocation5 + $0x3a4] sm:$0xf] }
  0x56   :  { %1416 = vmatpush.bf16.msrb.mxu3 %v3060_v52  ;;  %v3361_v46 = vld [vmem:[#allocation5 + $0x2b0] sm:$0xf0]  ;;  %v4597_v49 = vld [vmem:[#allocation5 + $0x4a4] sm:$0xf]  ;;  %v3764_v52 = vor.u32 %v4633_v41, %v3761_v42 }
  0x57   :  { %1378 = vmatpush.bf16.msrb.mxu0 %v3552_v62  ;;  %v3489_v48 = vld [vmem:[#allocation5 + $0x3b0] sm:$0xf0]  ;;  %v3364_v53 = vor.u32 %v4533_v43, %v3361_v46  ;;  %v4629_v56 = vld [vmem:[#allocation5 + $0x5a4] sm:$0xf] }
  0x58   :  { %1391 = vmatpush.bf16.msrb.mxu1 %v3680_v2  ;;  %v3617_v50 = vld [vmem:[#allocation5 + $0x4b0] sm:$0xf0]  ;;  %v3492_v54 = vor.u32 %v4565_v47, %v3489_v48  ;;  %v4529_v59 = vld [vmem:[#allocation5 + $0x284] sm:$0xf] }
  0x59   :  { %1429 = vmatpush.bf16.msra.mxu2 %v3188_v61  ;;  %v3745_v58 = vld [vmem:[#allocation5 + $0x5b0] sm:$0xf0]  ;;  %v3620_v60 = vor.u32 %v4597_v49, %v3617_v50  ;;  %v4561_v62 = vld [vmem:[#allocation5 + $0x384] sm:$0xf] }
  0x5a   :  { %1417 = vmatpush.bf16.msrb.mxu3 %v3044_v3  ;;  %v3345_v61 = vld [vmem:[#allocation5 + $0x290] sm:$0xf0]  ;;  %v4593_v0 = vld [vmem:[#allocation5 + $0x484] sm:$0xf]  ;;  %v3748_v2 = vor.u32 %v4629_v56, %v3745_v58  ;;  %v3143_v56 = vld [vmem:[#allocation5 + $0xe8] sm:$0xf] }
  0x5b   :  { %1379 = vmatpush.bf16.msrb.mxu0 %v3536_v15  ;;  %v3473_v63 = vld [vmem:[#allocation5 + $0x390] sm:$0xf0]  ;;  %v3348_v3 = vor.u32 %v4529_v59, %v3345_v61  ;;  %v4625_v5 = vld [vmem:[#allocation5 + $0x584] sm:$0xf]  ;;  %v4480_v58 = vld [vmem:[#allocation5 + $0xf4] sm:$0xf0] }
  0x5c   :  { %1392 = vmatpush.bf16.msrb.mxu1 %v3664_v19  ;;  %v3601_v1 = vld [vmem:[#allocation5 + $0x490] sm:$0xf0]  ;;  %v3476_v4 = vor.u32 %v4561_v62, %v3473_v63  ;;  %v4525_v8 = vld [vmem:[#allocation5 + $0x264] sm:$0xf]  ;;  %v3399_v62 = vld [vmem:[#allocation5 + $0x2e8] sm:$0xf] }
  0x5d   :  { %1430 = vmatpush.bf16.msra.mxu2 %v3172_v14  ;;  %v3729_v6 = vld [vmem:[#allocation5 + $0x590] sm:$0xf0]  ;;  %v3604_v9 = vor.u32 %v4593_v0, %v3601_v1  ;;  %v4557_v11 = vld [vmem:[#allocation5 + $0x364] sm:$0xf]  ;;  %v4544_v63 = vld [vmem:[#allocation5 + $0x2f4] sm:$0xf0] }
  0x5e   :  { %1418 = vmatpush.bf16.msrb.mxu3 %v3028_v20  ;;  %1380 = vmatmul.bf16.vlgmr.msrb.gmra.mxu0 %v5080_v30  ;;  %v3329_v10 = vld [vmem:[#allocation5 + $0x270] sm:$0xf0]  ;;  %v4589_v13 = vld [vmem:[#allocation5 + $0x464] sm:$0xf]  ;;  %v3732_v15 = vor.u32 %v4625_v5, %v3729_v6  ;;  %v3144_v5 = vor.u32 %v4480_v58, %v3143_v56  ;;  %v3527_v6 = vld [vmem:[#allocation5 + $0x3e8] sm:$0xf] }
  0x5f   :  { %1437 = vmatpush.bf16.msra.mxu0 %v3396_v24  ;;  %1393 = vmatmul.bf16.vlgmr.msrb.gmra.mxu1 %v5082_v35  ;;  %v3457_v12 = vld [vmem:[#allocation5 + $0x370] sm:$0xf0]  ;;  %v3332_v16 = vor.u32 %v4525_v8, %v3329_v10  ;;  %v4621_v18 = vld [vmem:[#allocation5 + $0x564] sm:$0xf]  ;;  %v4576_v8 = vld [vmem:[#allocation5 + $0x3f4] sm:$0xf0] }
  0x60   :  { %1450 = vmatpush.bf16.msra.mxu1 %v3524_v25  ;;  %v3585_v14 = vld [vmem:[#allocation5 + $0x470] sm:$0xf0]  ;;  %v3460_v17 = vor.u32 %v4557_v11, %v3457_v12  ;;  %v4521_v20 = vld [vmem:[#allocation5 + $0x244] sm:$0xf]  ;;  %v3271_v10 = vld [vmem:[#allocation5 + $0x1e8] sm:$0xf]  ;;  %v3400_v12 = vor.u32 %v4544_v63, %v3399_v62 }
  0x61   :  { %1431 = vmatpush.bf16.msra.mxu2 %v3156_v34  ;;  %1419 = vmatmul.bf16.vlgmr.msrb.gmra.mxu3 %v5066_v55  ;;  %v3713_v19 = vld [vmem:[#allocation5 + $0x570] sm:$0xf0]  ;;  %v3588_v21 = vor.u32 %v4589_v13, %v3585_v14  ;;  %v4553_v23 = vld [vmem:[#allocation5 + $0x344] sm:$0xf]  ;;  %v4512_v11 = vld [vmem:[#allocation5 + $0x1f4] sm:$0xf0] }
  0x62   :  { %1463 = vmatpush.bf16.msra.mxu3 %v3652_v29  ;;  %v3313_v22 = vld [vmem:[#allocation5 + $0x250] sm:$0xf0]  ;;  %v4585_v25 = vld [vmem:[#allocation5 + $0x444] sm:$0xf]  ;;  %v3716_v27 = vor.u32 %v4621_v18, %v3713_v19  ;;  %v3127_v14 = vld [vmem:[#allocation5 + $0xc8] sm:$0xf]  ;;  %v3272_v19 = vor.u32 %v4512_v11, %v3271_v10 }
  0x63   :  { %1438 = vmatpush.bf16.msra.mxu0 %v3380_v39  ;;  %v3441_v24 = vld [vmem:[#allocation5 + $0x350] sm:$0xf0]  ;;  %v3316_v28 = vor.u32 %v4521_v20, %v3313_v22  ;;  %v4617_v31 = vld [vmem:[#allocation5 + $0x544] sm:$0xf]  ;;  %v4540_v18 = vld [vmem:[#allocation5 + $0x2d4] sm:$0xf0] }
  0x64   :  { %1451 = vmatpush.bf16.msra.mxu1 %v3508_v40  ;;  %1432 = vmatmul.bf16.vlgmr.msra.gmra.mxu2 %v5072_v7  ;;  %v3569_v26 = vld [vmem:[#allocation5 + $0x450] sm:$0xf0]  ;;  %v3444_v29 = vor.u32 %v4553_v23, %v3441_v24  ;;  %v4517_v33 = vld [vmem:[#allocation5 + $0x224] sm:$0xf]  ;;  %v3511_v20 = vld [vmem:[#allocation5 + $0x3c8] sm:$0xf] }
  0x65   :  { %1476 = vmatpush.bf16.msrb.mxu2 %v3780_v38  ;;  %v3697_v32 = vld [vmem:[#allocation5 + $0x550] sm:$0xf0]  ;;  %v3572_v34 = vor.u32 %v4585_v25, %v3569_v26  ;;  %v4549_v37 = vld [vmem:[#allocation5 + $0x324] sm:$0xf]  ;;  %v3255_v23 = vld [vmem:[#allocation5 + $0x1c8] sm:$0xf] }
  0x66   :  { %1464 = vmatpush.bf16.msra.mxu3 %v3636_v44  ;;  %v3297_v36 = vld [vmem:[#allocation5 + $0x230] sm:$0xf0]  ;;  %v4581_v39 = vld [vmem:[#allocation5 + $0x424] sm:$0xf]  ;;  %v3700_v41 = vor.u32 %v4617_v31, %v3697_v32  ;;  %v4508_v24 = vld [vmem:[#allocation5 + $0x1d4] sm:$0xf0] }
  0x67   :  { %1439 = vmatpush.bf16.msra.mxu0 %v3364_v53  ;;  %v3425_v38 = vld [vmem:[#allocation5 + $0x330] sm:$0xf0]  ;;  %v4613_v42 = vld [vmem:[#allocation5 + $0x524] sm:$0xf]  ;;  %v3300_v46 = vor.u32 %v4517_v33, %v3297_v36  ;;  %v3111_v26 = vld [vmem:[#allocation5 + $0xa8] sm:$0xf]  ;;  %v3256_v32 = vor.u32 %v4508_v24, %v3255_v23 }
  0x68   :  { %1452 = vmatpush.bf16.msra.mxu1 %v3492_v54  ;;  %v3553_v40 = vld [vmem:[#allocation5 + $0x430] sm:$0xf0]  ;;  %v4513_v44 = vld [vmem:[#allocation5 + $0x204] sm:$0xf]  ;;  %v3428_v47 = vor.u32 %v4549_v37, %v3425_v38  ;;  %v4536_v31 = vld [vmem:[#allocation5 + $0x2b4] sm:$0xf0] }
  0x69   :  { %1477 = vmatpush.bf16.msrb.mxu2 %v3764_v52  ;;  %v3681_v43 = vld [vmem:[#allocation5 + $0x530] sm:$0xf0]  ;;  %v4545_v49 = vld [vmem:[#allocation5 + $0x304] sm:$0xf]  ;;  %v3556_v52 = vor.u32 %v4581_v39, %v3553_v40  ;;  %v3495_v33 = vld [vmem:[#allocation5 + $0x3a8] sm:$0xf] }
  0x6a   :  { %1465 = vmatpush.bf16.msra.mxu3 %v3620_v60  ;;  %v3281_v48 = vld [vmem:[#allocation5 + $0x210] sm:$0xf0]  ;;  %v4577_v53 = vld [vmem:[#allocation5 + $0x404] sm:$0xf]  ;;  %v3684_v60 = vor.u32 %v4613_v42, %v3681_v43  ;;  %v3239_v37 = vld [vmem:[#allocation5 + $0x1a8] sm:$0xf] }
  0x6b   :  { %1440 = vmatpush.bf16.msra.mxu0 %v3348_v3  ;;  %v3409_v50 = vld [vmem:[#allocation5 + $0x310] sm:$0xf0]  ;;  %v4641_v59 = vld [vmem:[#allocation5 + $0x604] sm:$0xf]  ;;  %v3284_v0 = vor.u32 %v4513_v44, %v3281_v48  ;;  %v4504_v38 = vld [vmem:[#allocation5 + $0x1b4] sm:$0xf0] }
  0x6c   :  { %1453 = vmatpush.bf16.msra.mxu1 %v3476_v4  ;;  %v3537_v54 = vld [vmem:[#allocation5 + $0x410] sm:$0xf0]  ;;  %v3412_v1 = vor.u32 %v4545_v49, %v3409_v50  ;;  %v3095_v40 = vld [vmem:[#allocation5 + $0x88] sm:$0xf]  ;;  %v4532_v44 = vld [vmem:[#allocation5 + $0x294] sm:$0xf0] }
  0x6d   :  { %1478 = vmatpush.bf16.msrb.mxu2 %v3748_v2  ;;  %v3793_v61 = vld [vmem:[#allocation5 + $0x610] sm:$0xf0]  ;;  %v4609_v2 = vld [vmem:[#allocation5 + $0x504] sm:$0xf]  ;;  %v3540_v4 = vor.u32 %v4577_v53, %v3537_v54  ;;  %v3351_v43 = vld [vmem:[#allocation5 + $0x288] sm:$0xf] }
  0x6e   :  { %1466 = vmatpush.bf16.msra.mxu3 %v3604_v9  ;;  %v3665_v3 = vld [vmem:[#allocation5 + $0x510] sm:$0xf0]  ;;  %v3796_v9 = vor.u32 %v4641_v59, %v3793_v61  ;;  %v4564_v48 = vld [vmem:[#allocation5 + $0x394] sm:$0xf0]  ;;  %v3223_v50 = vld [vmem:[#allocation5 + $0x188] sm:$0xf]  ;;  %v3352_v53 = vor.u32 %v4532_v44, %v3351_v43 }
  0x6f   :  { %1441 = vmatpush.bf16.msra.mxu0 %v3332_v16  ;;  %v3668_v13 = vor.u32 %v4609_v2, %v3665_v3  ;;  %v3528_v16 = vor.u32 %v4576_v8, %v3527_v6  ;;  %v3079_v54 = vld [vmem:[#allocation5 + $0x68] sm:$0xf]  ;;  %v4464_v56 = vld [vmem:[#allocation5 + $0x74] sm:$0xf0] }
  0x70   :  { %1454 = vmatpush.bf16.msra.mxu1 %v3460_v17  ;;  %v3383_v17 = vld [vmem:[#allocation5 + $0x2c8] sm:$0xf]  ;;  %v4560_v63 = vld [vmem:[#allocation5 + $0x374] sm:$0xf0] }
  0x71   :  { %1479 = vmatpush.bf16.msrb.mxu2 %v3732_v15  ;;  %v4476_v15 = vld [vmem:[#allocation5 + $0xd4] sm:$0xf0]  ;;  %v3384_v25 = vor.u32 %v4540_v18, %v3383_v17  ;;  %v3335_v59 = vld [vmem:[#allocation5 + $0x268] sm:$0xf] }
  0x72   :  { %1467 = vmatpush.bf16.msra.mxu3 %v3588_v21  ;;  %v4572_v21 = vld [vmem:[#allocation5 + $0x3d4] sm:$0xf0]  ;;  %v3128_v22 = vor.u32 %v4476_v15, %v3127_v14  ;;  %v3463_v62 = vld [vmem:[#allocation5 + $0x368] sm:$0xf] }
  0x73   :  { %1442 = vmatpush.bf16.msra.mxu0 %v3316_v28  ;;  %v3512_v28 = vor.u32 %v4572_v21, %v3511_v20  ;;  %v4496_v2 = vld [vmem:[#allocation5 + $0x174] sm:$0xf0]  ;;  %v3464_v6 = vor.u32 %v4560_v63, %v3463_v62  ;;  %v3319_v8 = vld [vmem:[#allocation5 + $0x248] sm:$0xf] }
  0x74   :  { %1455 = vmatpush.bf16.msra.mxu1 %v3444_v29  ;;  %v3367_v29 = vld [vmem:[#allocation5 + $0x2a8] sm:$0xf]  ;;  %v4492_v15 = vld [vmem:[#allocation5 + $0x154] sm:$0xf0] }
  0x75   :  { %1480 = vmatpush.bf16.msrb.mxu2 %v3716_v27  ;;  %v4472_v27 = vld [vmem:[#allocation5 + $0xb4] sm:$0xf0]  ;;  %v3368_v39 = vor.u32 %v4536_v31, %v3367_v29  ;;  %v3447_v11 = vld [vmem:[#allocation5 + $0x348] sm:$0xf] }
  0x76   :  { %1468 = vmatpush.bf16.msra.mxu3 %v3572_v34  ;;  %v4568_v34 = vld [vmem:[#allocation5 + $0x3b4] sm:$0xf0]  ;;  %v3112_v36 = vor.u32 %v4472_v27, %v3111_v26  ;;  %v3191_v14 = vld [vmem:[#allocation5 + $0x148] sm:$0xf] }
  0x77   :  { %1443 = vmatpush.bf16.msra.mxu0 %v3300_v46  ;;  %v3496_v42 = vor.u32 %v4568_v34, %v3495_v33  ;;  %v3240_v46 = vor.u32 %v4504_v38, %v3239_v37  ;;  %v3047_v17 = vld [vmem:[#allocation5 + $0x28] sm:$0xf]  ;;  %v4456_v18 = vld [vmem:[#allocation5 + $0x34] sm:$0xf0] }
  0x78   :  { %1456 = vmatpush.bf16.msra.mxu1 %v3428_v47  ;;  %v3479_v47 = vld [vmem:[#allocation5 + $0x388] sm:$0xf]  ;;  %v4520_v21 = vld [vmem:[#allocation5 + $0x234] sm:$0xf0] }
  0x79   :  { %1481 = vmatpush.bf16.msrb.mxu2 %v3700_v41  ;;  %v4468_v41 = vld [vmem:[#allocation5 + $0x94] sm:$0xf0]  ;;  %v3480_v58 = vor.u32 %v4564_v48, %v3479_v47  ;;  %v3303_v20 = vld [vmem:[#allocation5 + $0x228] sm:$0xf]  ;;  %v4478_v47 = vld [vmem:[#allocation5 + $0xec] sm:$0xf] }
  0x7a   :  { %1469 = vmatpush.bf16.msra.mxu3 %v3556_v52  ;;  %v3096_v49 = vor.u32 %v4468_v41, %v3095_v40  ;;  %v4500_v52 = vld [vmem:[#allocation5 + $0x194] sm:$0xf0]  ;;  %v3431_v23 = vld [vmem:[#allocation5 + $0x328] sm:$0xf]  ;;  %v3304_v29 = vor.u32 %v4520_v21, %v3303_v20  ;;  %v3145_v48 = vld [vmem:[#allocation5 + $0xf8] sm:$0xf0] }
  0x7b   :  { %1444 = vmatpush.bf16.msra.mxu0 %v3284_v0  ;;  %v3224_v61 = vor.u32 %v4500_v52, %v3223_v50  ;;  %v3080_v0 = vor.u32 %v4464_v56, %v3079_v54  ;;  %v4552_v24 = vld [vmem:[#allocation5 + $0x334] sm:$0xf0]  ;;  %v3175_v26 = vld [vmem:[#allocation5 + $0x128] sm:$0xf]  ;;  %v3148_v63 = vor.u32 %v4478_v47, %v3145_v48 }
  0x7c   :  { %1457 = vmatpush.bf16.msra.mxu1 %v3412_v1  ;;  %v3207_v1 = vld [vmem:[#allocation5 + $0x168] sm:$0xf]  ;;  %v4488_v27 = vld [vmem:[#allocation5 + $0x134] sm:$0xf0]  ;;  %v3432_v34 = vor.u32 %v4552_v24, %v3431_v23  ;;  %v3241_v23 = vld [vmem:[#allocation5 + $0x1b8] sm:$0xf0] }
  0x7d   :  { %1482 = vmatpush.bf16.msrb.mxu2 %v3684_v60  ;;  %v4528_v60 = vld [vmem:[#allocation5 + $0x274] sm:$0xf0]  ;;  %v3208_v10 = vor.u32 %v4496_v2, %v3207_v1  ;;  %v3287_v37 = vld [vmem:[#allocation5 + $0x208] sm:$0xf]  ;;  %v3176_v40 = vor.u32 %v4488_v27, %v3175_v26  ;;  %v4474_v1 = vld [vmem:[#allocation5 + $0xcc] sm:$0xf] }
  0x7e   :  { %1470 = vmatpush.bf16.msra.mxu3 %v3540_v4  ;;  %1445 = vmatmul.bf16.vlgmr.msra.gmra.mxu0 %v5064_v51  ;;  %v3336_v3 = vor.u32 %v4528_v60, %v3335_v59  ;;  %v3063_v4 = vld [vmem:[#allocation5 + $0x48] sm:$0xf]  ;;  %v4452_v31 = vld [vmem:[#allocation5 + $0x14] sm:$0xf0]  ;;  %v4510_v60 = vld [vmem:[#allocation5 + $0x1ec] sm:$0xf] }
  0x7f   :  { %1528 = vmatpush.bf16.msrb.mxu0 %v3400_v12  ;;  %1458 = vmatmul.bf16.vlgmr.msra.gmra.mxu1 %v5068_v57  ;;  %v4556_v12 = vld [vmem:[#allocation5 + $0x354] sm:$0xf0]  ;;  %v3783_v52 = vld [vmem:[#allocation5 + $0x5e8] sm:$0xf]  ;;  %v3129_v2 = vld [vmem:[#allocation5 + $0xd8] sm:$0xf0] }
  0x80   :  { %1502 = vmatpush.bf16.msrb.mxu1 %v3144_v5  ;;  %v4460_v5 = vld [vmem:[#allocation5 + $0x54] sm:$0xf0]  ;;  %v3639_v54 = vld [vmem:[#allocation5 + $0x4c8] sm:$0xf]  ;;  %v4466_v26 = vld [vmem:[#allocation5 + $0x8c] sm:$0xf] }
  0x81   :  { %1483 = vmatpush.bf16.msrb.mxu2 %v3668_v13  ;;  %1471 = vmatmul.bf16.vlgmr.msra.gmra.mxu3 %v5080_v30  ;;  %v3064_v13 = vor.u32 %v4460_v5, %v3063_v4  ;;  %v4608_v33 = vld [vmem:[#allocation5 + $0x4f4] sm:$0xf0]  ;;  %v3767_v5 = vld [vmem:[#allocation5 + $0x5c8] sm:$0xf]  ;;  %v3097_v27 = vld [vmem:[#allocation5 + $0x98] sm:$0xf0] }
  0x82   :  { %1496 = vmatpush.bf16.msrb.mxu3 %v3796_v9  ;;  %v4524_v9 = vld [vmem:[#allocation5 + $0x254] sm:$0xf0]  ;;  %v3607_v20 = vld [vmem:[#allocation5 + $0x488] sm:$0xf] }
  0x83   :  { %1529 = vmatpush.bf16.msrb.mxu0 %v3384_v25  ;;  %v3048_v25 = vor.u32 %v4456_v18, %v3047_v17  ;;  %v4516_v38 = vld [vmem:[#allocation5 + $0x214] sm:$0xf0]  ;;  %v3751_v18 = vld [vmem:[#allocation5 + $0x5a8] sm:$0xf] }
  0x84   :  { %1503 = vmatpush.bf16.msrb.mxu1 %v3128_v22  ;;  %1484 = vmatmul.bf16.vlgmr.msrb.gmra.mxu2 %v5082_v35  ;;  %v3192_v22 = vor.u32 %v4492_v15, %v3191_v14  ;;  %v4548_v41 = vld [vmem:[#allocation5 + $0x314] sm:$0xf0]  ;;  %v3288_v50 = vor.u32 %v4516_v38, %v3287_v37  ;;  %v4470_v14 = vld [vmem:[#allocation5 + $0xac] sm:$0xf]  ;;  %v3113_v15 = vld [vmem:[#allocation5 + $0xb8] sm:$0xf0]  ;;  %v3100_v38 = vor.u32 %v4466_v26, %v3097_v27 }
  0x85   :  { %1541 = vmatpush.bf16.msra.mxu2 %v3528_v16  ;;  %v3320_v16 = vor.u32 %v4524_v9, %v3319_v8  ;;  %v4644_v43 = vld [vmem:[#allocation5 + $0x614] sm:$0xf0]  ;;  %v3623_v8 = vld [vmem:[#allocation5 + $0x4a8] sm:$0xf]  ;;  %v3116_v24 = vor.u32 %v4470_v14, %v3113_v15  ;;  %v3225_v37 = vld [vmem:[#allocation5 + $0x198] sm:$0xf0] }
  0x86   :  { %1515 = vmatpush.bf16.msra.mxu3 %v3272_v19  ;;  %v3448_v19 = vor.u32 %v4556_v12, %v3447_v11  ;;  %v4600_v9 = vld [vmem:[#allocation5 + $0x4b4] sm:$0xf0]  ;;  %v3257_v11 = vld [vmem:[#allocation5 + $0x1d8] sm:$0xf0]  ;;  %v3132_v12 = vor.u32 %v4474_v1, %v3129_v2  ;;  %v3575_v47 = vld [vmem:[#allocation5 + $0x448] sm:$0xf] }
  0x87   :  { %1530 = vmatpush.bf16.msrb.mxu0 %v3368_v39  ;;  %v3415_v39 = vld [vmem:[#allocation5 + $0x308] sm:$0xf]  ;;  %v4596_v21 = vld [vmem:[#allocation5 + $0x494] sm:$0xf0]  ;;  %v3193_v1 = vld [vmem:[#allocation5 + $0x158] sm:$0xf0] }
  0x88   :  { %1504 = vmatpush.bf16.msrb.mxu1 %v3112_v36  ;;  %v3159_v36 = vld [vmem:[#allocation5 + $0x108] sm:$0xf]  ;;  %v3416_v56 = vor.u32 %v4548_v41, %v3415_v39  ;;  %v3081_v41 = vld [vmem:[#allocation5 + $0x78] sm:$0xf0]  ;;  %v4588_v48 = vld [vmem:[#allocation5 + $0x454] sm:$0xf0] }
  0x89   :  { %1542 = vmatpush.bf16.msra.mxu2 %v3512_v28  ;;  %v3031_v28 = vld [vmem:[#allocation5 + $0x8] sm:$0xf]  ;;  %v3177_v14 = vld [vmem:[#allocation5 + $0x138] sm:$0xf0] }
  0x8a   :  { %1516 = vmatpush.bf16.msra.mxu3 %v3256_v32  ;;  %v3655_v32 = vld [vmem:[#allocation5 + $0x4e8] sm:$0xf]  ;;  %v3032_v44 = vor.u32 %v4452_v31, %v3031_v28  ;;  %v3608_v28 = vor.u32 %v4596_v21, %v3607_v20  ;;  %v4450_v20 = vld [vmem:[#allocation5 + $0xc] sm:$0xf]  ;;  %v3033_v21 = vld [vmem:[#allocation5 + $0x18] sm:$0xf0] }
  0x8b   :  { %1531 = vmatpush.bf16.msrb.mxu0 %v3352_v53  ;;  %v4640_v53 = vld [vmem:[#allocation5 + $0x5f4] sm:$0xf0]  ;;  %v3735_v31 = vld [vmem:[#allocation5 + $0x588] sm:$0xf]  ;;  %v3529_v26 = vld [vmem:[#allocation5 + $0x3f8] sm:$0xf0] }
  0x8c   :  { %1505 = vmatpush.bf16.msrb.mxu1 %v3096_v49  ;;  %v3656_v49 = vor.u32 %v4608_v33, %v3655_v32  ;;  %v4628_v32 = vld [vmem:[#allocation5 + $0x594] sm:$0xf0]  ;;  %v3591_v33 = vld [vmem:[#allocation5 + $0x468] sm:$0xf] }
  0x8d   :  { %1543 = vmatpush.bf16.msra.mxu2 %v3496_v42  ;;  %v3799_v42 = vld [vmem:[#allocation5 + $0x608] sm:$0xf]  ;;  %v3736_v39 = vor.u32 %v4628_v32, %v3735_v31  ;;  %v4538_v31 = vld [vmem:[#allocation5 + $0x2cc] sm:$0xf]  ;;  %v3036_v32 = vor.u32 %v4450_v20, %v3033_v21 }
  0x8e   :  { %1517 = vmatpush.bf16.msra.mxu3 %v3240_v46  ;;  %v4484_v46 = vld [vmem:[#allocation5 + $0x114] sm:$0xf0]  ;;  %v3800_v59 = vor.u32 %v4644_v43, %v3799_v42  ;;  %v4558_v20 = vld [vmem:[#allocation5 + $0x36c] sm:$0xf] }
  0x8f   :  { %1532 = vmatpush.bf16.msrb.mxu0 %v3336_v3  ;;  %v3160_v62 = vor.u32 %v4484_v46, %v3159_v36  ;;  %v4498_v36 = vld [vmem:[#allocation5 + $0x18c] sm:$0xf]  ;;  %v4624_v46 = vld [vmem:[#allocation5 + $0x574] sm:$0xf0] }
  0x90   :  { %1506 = vmatpush.bf16.msrb.mxu1 %v3080_v0  ;;  %v3784_v0 = vor.u32 %v4640_v53, %v3783_v52  ;;  %v3228_v43 = vor.u32 %v4498_v36, %v3225_v37  ;;  %v3161_v36 = vld [vmem:[#allocation5 + $0x118] sm:$0xf0] }
  0x91   :  { %1544 = vmatpush.bf16.msra.mxu2 %v3480_v58  ;;  %3806 = vmatmul.msk.bf16.vlgmr.msrb.gmra.mxu3 %vm1316_vm0, %v5076_v45  ;;  %v4604_v58 = vld [vmem:[#allocation5 + $0x4d4] sm:$0xf0] }
  0x92   :  { %1518 = vmatpush.bf16.msra.mxu3 %v3224_v61  ;;  %v3273_v61 = vld [vmem:[#allocation5 + $0x1f8] sm:$0xf0]  ;;  %v3640_v3 = vor.u32 %v4604_v58, %v3639_v54  ;;  %v4458_v54 = vld [vmem:[#allocation5 + $0x4c] sm:$0xf]  ;;  %v3576_v58 = vor.u32 %v4588_v48, %v3575_v47 }
  0x93   :  { %1533 = vmatpush.bf16.msrb.mxu0 %v3320_v16  ;;  %v3276_v4 = vor.u32 %v4510_v60, %v3273_v61  ;;  %v3624_v16 = vor.u32 %v4600_v9, %v3623_v8  ;;  %v3703_v60 = vld [vmem:[#allocation5 + $0x548] sm:$0xf]  ;;  %v4620_v61 = vld [vmem:[#allocation5 + $0x554] sm:$0xf0]  ;;  %v4602_v47 = vld [vmem:[#allocation5 + $0x4cc] sm:$0xf] }
  0x94   :  { %1507 = vmatpush.bf16.msrb.mxu1 %v3064_v13  ;;  %v3687_v9 = vld [vmem:[#allocation5 + $0x528] sm:$0xf]  ;;  %v3641_v48 = vld [vmem:[#allocation5 + $0x4d8] sm:$0xf0] }
  0x95   :  { %1545 = vmatpush.bf16.msra.mxu2 %v3464_v6  ;;  %v4636_v6 = vld [vmem:[#allocation5 + $0x5d4] sm:$0xf0] }
  0x96   :  { %1519 = vmatpush.bf16.msra.mxu3 %v3208_v10  ;;  %v4506_v10 = vld [vmem:[#allocation5 + $0x1cc] sm:$0xf]  ;;  %v3768_v13 = vor.u32 %v4636_v6, %v3767_v5  ;;  %v3049_v5 = vld [vmem:[#allocation5 + $0x38] sm:$0xf0] }
  0x97   :  { %1534 = vmatpush.bf16.msrb.mxu0 %v3304_v29  ;;  %v3260_v17 = vor.u32 %v4506_v10, %v3257_v11  ;;  %v4616_v10 = vld [vmem:[#allocation5 + $0x534] sm:$0xf0]  ;;  %v3543_v11 = vld [vmem:[#allocation5 + $0x408] sm:$0xf] }
  0x98   :  { %1508 = vmatpush.bf16.msrb.mxu1 %v3048_v25 }
  0x99   :  { %1546 = vmatpush.bf16.msra.mxu2 %v3448_v19  ;;  %v4632_v19 = vld [vmem:[#allocation5 + $0x5b4] sm:$0xf0] }
  0x9a   :  { %1520 = vmatpush.bf16.msra.mxu3 %v3192_v22  ;;  %v4502_v22 = vld [vmem:[#allocation5 + $0x1ac] sm:$0xf]  ;;  %v3752_v25 = vor.u32 %v4632_v19, %v3751_v18  ;;  %v3688_v18 = vor.u32 %v4616_v10, %v3687_v9  ;;  %v3671_v19 = vld [vmem:[#allocation5 + $0x508] sm:$0xf]  ;;  %v3481_v10 = vld [vmem:[#allocation5 + $0x398] sm:$0xf0] }
  0x9b   :  { %1535 = vmatpush.bf16.msrb.mxu0 %v3288_v50  ;;  %v3244_v29 = vor.u32 %v4502_v22, %v3241_v23  ;;  %v3209_v50 = vld [vmem:[#allocation5 + $0x178] sm:$0xf0] }
  0x9c   :  { %1509 = vmatpush.bf16.msrb.mxu1 %v3032_v44  ;;  %v3719_v44 = vld [vmem:[#allocation5 + $0x568] sm:$0xf] }
  0x9d   :  { %1547 = vmatpush.bf16.msra.mxu2 %v3432_v34  ;;  %v4592_v34 = vld [vmem:[#allocation5 + $0x474] sm:$0xf0]  ;;  %v3720_v53 = vor.u32 %v4624_v46, %v3719_v44  ;;  %v3513_v46 = vld [vmem:[#allocation5 + $0x3d8] sm:$0xf0] }
  0x9e   :  { %1521 = vmatpush.bf16.msra.mxu3 %v3176_v40  ;;  %1536 = vmatmul.bf16.vlgmr.msrb.gmra.mxu0 %v5064_v51  ;;  %v4462_v40 = vld [vmem:[#allocation5 + $0x6c] sm:$0xf]  ;;  %v3592_v42 = vor.u32 %v4592_v34, %v3591_v33  ;;  %v3385_v33 = vld [vmem:[#allocation5 + $0x2d8] sm:$0xf0] }
  0x9f   :  { %1587 = vmatpush.bf16.msra.mxu0 %v3800_v59  ;;  %1510 = vmatmul.bf16.vlgmr.msrb.gmra.mxu1 %v5066_v55  ;;  %v3084_v52 = vor.u32 %v4462_v40, %v3081_v41  ;;  %v4482_v34 = vld [vmem:[#allocation5 + $0x10c] sm:$0xf] }
  0xa0   :  { %1554 = vmatpush.bf16.msra.mxu1 %v3656_v49  ;;  %v4494_v49 = vld [vmem:[#allocation5 + $0x16c] sm:$0xf]  ;;  %v3164_v44 = vor.u32 %v4482_v34, %v3161_v36 }
  0xa1   :  { %1548 = vmatpush.bf16.msra.mxu2 %v3416_v56  ;;  %v3065_v56 = vld [vmem:[#allocation5 + $0x58] sm:$0xf0]  ;;  %v3212_v59 = vor.u32 %v4494_v49, %v3209_v50  ;;  %v4534_v50 = vld [vmem:[#allocation5 + $0x2ac] sm:$0xf] }
  0xa2   :  { %1522 = vmatpush.bf16.msra.mxu3 %v3160_v62  ;;  %v3559_v62 = vld [vmem:[#allocation5 + $0x428] sm:$0xf]  ;;  %v3068_v2 = vor.u32 %v4458_v54, %v3065_v56  ;;  %v3769_v54 = vld [vmem:[#allocation5 + $0x5d8] sm:$0xf0]  ;;  %v4554_v34 = vld [vmem:[#allocation5 + $0x34c] sm:$0xf] }
  0xa3   :  { %1606 = vmatpush.bf16.msrb.mxu0 %v3276_v4  ;;  %v4454_v4 = vld [vmem:[#allocation5 + $0x2c] sm:$0xf] }
  0xa4   :  { %1555 = vmatpush.bf16.msra.mxu1 %v3640_v3  ;;  %1549 = vmatmul.bf16.vlgmr.msra.gmra.mxu2 %v5068_v57  ;;  %v3704_v3 = vor.u32 %v4620_v61, %v3703_v60  ;;  %v3052_v15 = vor.u32 %v4454_v4, %v3049_v5  ;;  %v3497_v61 = vld [vmem:[#allocation5 + $0x3b8] sm:$0xf0] }
  0xa5   :  { %1593 = vmatpush.bf16.msrb.mxu2 %v3148_v63  ;;  %1523 = vmatmul.bf16.vlgmr.msra.gmra.mxu3 %v5072_v7  ;;  %v4584_v63 = vld [vmem:[#allocation5 + $0x434] sm:$0xf0]  ;;  %v3753_v4 = vld [vmem:[#allocation5 + $0x5b8] sm:$0xf0] }
  0xa6   :  { %1567 = vmatpush.bf16.msrb.mxu3 %v3784_v0  ;;  %v4490_v0 = vld [vmem:[#allocation5 + $0x14c] sm:$0xf]  ;;  %v3560_v6 = vor.u32 %v4584_v63, %v3559_v62  ;;  %v3625_v63 = vld [vmem:[#allocation5 + $0x4b8] sm:$0xf0] }
  0xa7   :  { %1607 = vmatpush.bf16.msrb.mxu0 %v3260_v17  ;;  %v3196_v8 = vor.u32 %v4490_v0, %v3193_v1  ;;  %v3401_v17 = vld [vmem:[#allocation5 + $0x2f8] sm:$0xf0]  ;;  %v4598_v62 = vld [vmem:[#allocation5 + $0x4ac] sm:$0xf] }
  0xa8   :  { %1556 = vmatpush.bf16.msra.mxu1 %v3624_v16  ;;  %v4542_v16 = vld [vmem:[#allocation5 + $0x2ec] sm:$0xf] }
  0xa9   :  { %1594 = vmatpush.bf16.msrb.mxu2 %v3132_v12  ;;  %v4580_v12 = vld [vmem:[#allocation5 + $0x414] sm:$0xf0]  ;;  %v3404_v27 = vor.u32 %v4542_v16, %v3401_v17  ;;  %v4530_v1 = vld [vmem:[#allocation5 + $0x28c] sm:$0xf]  ;;  %v3737_v17 = vld [vmem:[#allocation5 + $0x598] sm:$0xf0] }
  0xaa   :  { %1568 = vmatpush.bf16.msrb.mxu3 %v3768_v13  ;;  %v4486_v13 = vld [vmem:[#allocation5 + $0x12c] sm:$0xf]  ;;  %v3544_v22 = vor.u32 %v4580_v12, %v3543_v11  ;;  %v3609_v12 = vld [vmem:[#allocation5 + $0x498] sm:$0xf0] }
  0xab   :  { %1608 = vmatpush.bf16.msrb.mxu0 %v3244_v29  ;;  %v3180_v23 = vor.u32 %v4486_v13, %v3177_v14  ;;  %v3657_v29 = vld [vmem:[#allocation5 + $0x4f8] sm:$0xf0]  ;;  %v4594_v11 = vld [vmem:[#allocation5 + $0x48c] sm:$0xf] }
  0xac   :  { %1557 = vmatpush.bf16.msra.mxu1 %v3608_v28  ;;  %v4606_v28 = vld [vmem:[#allocation5 + $0x4ec] sm:$0xf] }
  0xad   :  { %1595 = vmatpush.bf16.msrb.mxu2 %v3116_v24  ;;  %v4612_v24 = vld [vmem:[#allocation5 + $0x514] sm:$0xf0]  ;;  %v3660_v41 = vor.u32 %v4606_v28, %v3657_v29  ;;  %v4526_v14 = vld [vmem:[#allocation5 + $0x26c] sm:$0xf]  ;;  %v3721_v29 = vld [vmem:[#allocation5 + $0x578] sm:$0xf0] }
  0xae   :  { %1569 = vmatpush.bf16.msrb.mxu3 %v3752_v25  ;;  %3807 = vmatmul.msk.bf16.vlgmr.msra.gmra.mxu0 %vm1316_vm0, %v5076_v45  ;;  %v4574_v25 = vld [vmem:[#allocation5 + $0x3ec] sm:$0xf]  ;;  %v3672_v37 = vor.u32 %v4612_v24, %v3671_v19  ;;  %v3612_v19 = vor.u32 %v4594_v11, %v3609_v12  ;;  %v3593_v24 = vld [vmem:[#allocation5 + $0x478] sm:$0xf0] }
  0xaf   :  { %1609 = vmatpush.bf16.msrb.mxu0 %v3228_v43  ;;  %v3532_v40 = vor.u32 %v4574_v25, %v3529_v26  ;;  %v3388_v43 = vor.u32 %v4538_v31, %v3385_v33  ;;  %v4522_v26 = vld [vmem:[#allocation5 + $0x24c] sm:$0xf]  ;;  %v3545_v11 = vld [vmem:[#allocation5 + $0x418] sm:$0xf0] }
  0xb0   :  { %1558 = vmatpush.bf16.msra.mxu1 %v3592_v42  ;;  %v4570_v42 = vld [vmem:[#allocation5 + $0x3cc] sm:$0xf] }
  0xb1   :  { %1596 = vmatpush.bf16.msrb.mxu2 %v3100_v38  ;;  %v4638_v38 = vld [vmem:[#allocation5 + $0x5ec] sm:$0xf]  ;;  %v3516_v56 = vor.u32 %v4570_v42, %v3513_v46 }
  0xb2   :  { %1570 = vmatpush.bf16.msrb.mxu3 %v3736_v39  ;;  %v3785_v39 = vld [vmem:[#allocation5 + $0x5f8] sm:$0xf0]  ;;  %v4622_v28 = vld [vmem:[#allocation5 + $0x56c] sm:$0xf] }
  0xb3   :  { %1610 = vmatpush.bf16.msrb.mxu0 %v3212_v59  ;;  %v3788_v49 = vor.u32 %v4638_v38, %v3785_v39  ;;  %v4566_v59 = vld [vmem:[#allocation5 + $0x3ac] sm:$0xf]  ;;  %v3449_v38 = vld [vmem:[#allocation5 + $0x358] sm:$0xf0] }
  0xb4   :  { %1559 = vmatpush.bf16.msra.mxu1 %v3576_v58  ;;  %v3644_v58 = vor.u32 %v4602_v47, %v3641_v48  ;;  %v3500_v5 = vor.u32 %v4566_v59, %v3497_v61  ;;  %v4586_v39 = vld [vmem:[#allocation5 + $0x44c] sm:$0xf]  ;;  %v3705_v47 = vld [vmem:[#allocation5 + $0x558] sm:$0xf0]  ;;  %v3452_v48 = vor.u32 %v4554_v34, %v3449_v38  ;;  %v3891_v38 = vld [vmem:[#allocation8 + $0xa0] sm:$0xf] }
  0xb5   :  { %1597 = vmatpush.bf16.msrb.mxu2 %v3084_v52  ;;  %v3369_v52 = vld [vmem:[#allocation5 + $0x2b8] sm:$0xf0]  ;;  %v4518_v42 = vld [vmem:[#allocation5 + $0x22c] sm:$0xf] }
  0xb6   :  { %1571 = vmatpush.bf16.msrb.mxu3 %v3720_v53  ;;  %v4634_v53 = vld [vmem:[#allocation5 + $0x5cc] sm:$0xf]  ;;  %v3372_v60 = vor.u32 %v4534_v50, %v3369_v52 }
  0xb7   :  { %1611 = vmatpush.bf16.msrb.mxu0 %v3196_v8  ;;  %v3772_v0 = vor.u32 %v4634_v53, %v3769_v54  ;;  %v4562_v8 = vld [vmem:[#allocation5 + $0x38c] sm:$0xf]  ;;  %v3433_v53 = vld [vmem:[#allocation5 + $0x338] sm:$0xf0] }
  0xb8   :  { %1560 = vmatpush.bf16.msra.mxu1 %v3560_v6  ;;  %v3628_v6 = vor.u32 %v4598_v62, %v3625_v63  ;;  %v4618_v46 = vld [vmem:[#allocation5 + $0x54c] sm:$0xf]  ;;  %v3689_v63 = vld [vmem:[#allocation5 + $0x538] sm:$0xf0] }
  0xb9   :  { %1598 = vmatpush.bf16.msrb.mxu2 %v3068_v2  ;;  %v3353_v2 = vld [vmem:[#allocation5 + $0x298] sm:$0xf0]  ;;  %v4550_v50 = vld [vmem:[#allocation5 + $0x32c] sm:$0xf] }
  0xba   :  { %1572 = vmatpush.bf16.msrb.mxu3 %v3704_v3  ;;  %v4630_v3 = vld [vmem:[#allocation5 + $0x5ac] sm:$0xf]  ;;  %v3356_v9 = vor.u32 %v4530_v1, %v3353_v2  ;;  %v3801_v1 = vld [vmem:[#allocation5 + $0x618] sm:$0xf0]  ;;  %v5112_v2 = vld [vmem:[#allocation7] sm:$0xf] }
  0xbb   :  { %1612 = vmatpush.bf16.msrb.mxu0 %v3180_v23  ;;  %v3756_v13 = vor.u32 %v4630_v3, %v3753_v4  ;;  %v5104_v16 = vpop.f32.mrf.mxu0  ;;  %v4590_v23 = vld [vmem:[#allocation5 + $0x46c] sm:$0xf]  ;;  %v3436_v4 = vor.u32 %v4550_v50, %v3433_v53 }
  0xbc   :  { %1561 = vmatpush.bf16.msra.mxu1 %v3544_v22  ;;  %v3465_v22 = vld [vmem:[#allocation5 + $0x378] sm:$0xf0]  ;;  %v3596_v33 = vor.u32 %v4590_v23, %v3593_v24  ;;  %v4582_v54 = vld [vmem:[#allocation5 + $0x42c] sm:$0xf] }
  0xbd   :  { %1599 = vmatpush.bf16.msrb.mxu2 %v3052_v15  ;;  %v3337_v15 = vld [vmem:[#allocation5 + $0x278] sm:$0xf0]  ;;  %v4514_v59 = vld [vmem:[#allocation5 + $0x20c] sm:$0xf] }
  0xbe   :  { %1573 = vmatpush.bf16.msrb.mxu3 %v3688_v18  ;;  %v3484_v18 = vor.u32 %v4562_v8, %v3481_v10  ;;  %v3340_v21 = vor.u32 %v4526_v14, %v3337_v15  ;;  %v4614_v61 = vld [vmem:[#allocation5 + $0x52c] sm:$0xf]  ;;  %v3923_v14 = vld [vmem:[#allocation8 + $0xe0] sm:$0xf]  ;;  %v4675_v15 = vld [vmem:[#allocation8 + $0xec] sm:$0xf0] }
  0xbf   :  { %1562 = vmatmul.bf16.vlgmr.msra.gmra.mxu1 %v5080_v30  ;;  %1613 = vmatpush.bf16.msrb.mxu0 %v3164_v44  ;;  %v4578_v10 = vld [vmem:[#allocation5 + $0x40c] sm:$0xf]  ;;  %v3924_v24 = vor.u32 %v4675_v15, %v3923_v14  ;;  %v3811_v14 = vld [vmem:[#allocation8] sm:$0xf]  ;;  %v4647_v15 = vld [vmem:[#allocation8 + $0xc] sm:$0xf0] }
  0xc0   :  { %1619 = vmatpush.bf16.msrb.mxu1 %v3404_v27  ;;  %v3321_v27 = vld [vmem:[#allocation5 + $0x258] sm:$0xf0]  ;;  %v3548_v23 = vor.u32 %v4578_v10, %v3545_v11  ;;  %v3955_v11 = vld [vmem:[#allocation8 + $0x120] sm:$0xf] }
  0xc1   :  { %1600 = vmatpush.bf16.msrb.mxu2 %v3036_v32  ;;  %v3468_v32 = vor.u32 %v4558_v20, %v3465_v22  ;;  %v3324_v36 = vor.u32 %v4522_v26, %v3321_v27  ;;  %v4707_v20 = vld [vmem:[#allocation8 + $0x1ec] sm:$0xf0]  ;;  %v3907_v26 = vld [vmem:[#allocation8 + $0xc0] sm:$0xf] }
  0xc2   :  { %1574 = vmatpush.bf16.msrb.mxu3 %v3672_v37  ;;  %1614 = vmatmul.bf16.vlgmr.msrb.gmra.mxu0 %v5072_v7  ;;  %v5106_v25 = vpop.f32.mrf.mxu1  ;;  %v4671_v27 = vld [vmem:[#allocation8 + $0xcc] sm:$0xf0] }
  0xc3   :  { %1658 = vmatpush.bf16.msra.mxu0 %v3788_v49  ;;  %v5108_v31 = vpop.f32.mrf.mxu2  ;;  %v1331_v44 = vpop.f32.mrf.mxu0 }
  0xc4   :  { %1620 = vmatpush.bf16.msrb.mxu1 %v3388_v43  ;;  %1601 = vmatmul.bf16.vlgmr.msrb.gmra.mxu2 %v5066_v55  ;;  %v4626_v55 = vld [vmem:[#allocation5 + $0x58c] sm:$0xf]  ;;  %v3305_v43 = vld [vmem:[#allocation5 + $0x238] sm:$0xf0]  ;;  %v4663_v44 = vld [vmem:[#allocation8 + $0x8c] sm:$0xf0] }
  0xc5   :  { %1645 = vmatpush.bf16.msra.mxu2 %v3660_v41  ;;  %1575 = vmatmul.bf16.vlgmr.msrb.gmra.mxu3 %v5082_v35  ;;  %v3740_v7 = vor.u32 %v4626_v55, %v3737_v17  ;;  %v3724_v41 = vor.u32 %v4622_v28, %v3721_v29  ;;  %v3308_v52 = vor.u32 %v4518_v42, %v3305_v43  ;;  %v4610_v55 = vld [vmem:[#allocation5 + $0x50c] sm:$0xf]  ;;  %v4035_v29 = vld [vmem:[#allocation8 + $0x1c0] sm:$0xf]  ;;  %v4699_v42 = vld [vmem:[#allocation8 + $0x1ac] sm:$0xf0] }
  0xc6   :  { %1632 = vmatpush.bf16.msra.mxu3 %v3532_v40  ;;  %v5110_v37 = vpop.f32.mrf.mxu3  ;;  %v3577_v40 = vld [vmem:[#allocation5 + $0x458] sm:$0xf0] }
  0xc7   :  { %1659 = vmatpush.bf16.msra.mxu0 %v3772_v0  ;;  %v3580_v49 = vor.u32 %v4586_v39, %v3577_v40  ;;  %v4642_v0 = vld [vmem:[#allocation5 + $0x60c] sm:$0xf]  ;;  %v4667_v39 = vld [vmem:[#allocation8 + $0xac] sm:$0xf0] }
  0xc8   :  { %1621 = vmatpush.bf16.msrb.mxu1 %v3372_v60  ;;  %v3289_v60 = vld [vmem:[#allocation5 + $0x218] sm:$0xf0]  ;;  %v3804_v17 = vor.u32 %v4642_v0, %v3801_v1  ;;  %v3971_v0 = vld [vmem:[#allocation8 + $0x140] sm:$0xf]  ;;  %v4687_v1 = vld [vmem:[#allocation8 + $0x14c] sm:$0xf0] }
  0xc9   :  { %1646 = vmatpush.bf16.msra.mxu2 %v3644_v58  ;;  %v3708_v58 = vor.u32 %v4618_v46, %v3705_v47  ;;  %v3292_v8 = vor.u32 %v4514_v59, %v3289_v60  ;;  %v3972_v10 = vor.u32 %v4687_v1, %v3971_v0  ;;  %v4723_v0 = vld [vmem:[#allocation8 + $0x26c] sm:$0xf0]  ;;  %v329_v1 = vperm.slane %v5112_v2, 1 }
  0xca   :  { %1633 = vmatpush.bf16.msra.mxu3 %v3516_v56  ;;  %v3561_v56 = vld [vmem:[#allocation5 + $0x438] sm:$0xf0]  ;;  %v1344_v62 = vpop.f32.mrf.mxu1 }
  0xcb   :  { %1660 = vmatpush.bf16.msra.mxu0 %v3756_v13  ;;  %v1357_v3 = vpop.f32.mrf.mxu2  ;;  %v3692_v13 = vor.u32 %v4614_v61, %v3689_v63  ;;  %v3843_v61 = vld [vmem:[#allocation8 + $0x40] sm:$0xf]  ;;  %v4655_v62 = vld [vmem:[#allocation8 + $0x4c] sm:$0xf0] }
  0xcc   :  { %1622 = vmatpush.bf16.msrb.mxu1 %v3356_v9  ;;  %v3417_v9 = vld [vmem:[#allocation5 + $0x318] sm:$0xf0] }
  0xcd   :  { %1647 = vmatpush.bf16.msra.mxu2 %v3628_v6  ;;  %v4546_v6 = vld [vmem:[#allocation5 + $0x30c] sm:$0xf] }
  0xce   :  { %1634 = vmatpush.bf16.msra.mxu3 %v3500_v5  ;;  %v3564_v5 = vor.u32 %v4582_v54, %v3561_v56  ;;  %v1370_v12 = vpop.f32.mrf.mxu3  ;;  %v3420_v22 = vor.u32 %v4546_v6, %v3417_v9  ;;  %v4659_v54 = vld [vmem:[#allocation8 + $0x6c] sm:$0xf0]  ;;  %v3987_v56 = vld [vmem:[#allocation8 + $0x160] sm:$0xf] }
  0xcf   :  { %1661 = vmatpush.bf16.msra.mxu0 %v3740_v7  ;;  %v4651_v9 = vld [vmem:[#allocation8 + $0x2c] sm:$0xf0] }
  0xd0   :  { %1623 = vmatpush.bf16.msrb.mxu1 %v3340_v21  ;;  %v328_v21 = vperm.slane %v5112_v2, 0  ;;  %v4683_v12 = vld [vmem:[#allocation8 + $0x12c] sm:$0xf0] }
  0xd1   :  { %1648 = vmatpush.bf16.msra.mxu2 %v3612_v19  ;;  %v4051_v19 = vld [vmem:[#allocation8 + $0x1e0] sm:$0xf] }
  0xd2   :  { %1635 = vmatpush.bf16.msra.mxu3 %v3484_v18  ;;  %v3673_v18 = vld [vmem:[#allocation5 + $0x518] sm:$0xf0]  ;;  %v4052_v28 = vor.u32 %v4707_v20, %v4051_v19  ;;  %v4739_v19 = vld [vmem:[#allocation8 + $0x2ec] sm:$0xf0] }
  0xd3   :  { %1662 = vmatpush.bf16.msra.mxu0 %v3724_v41  ;;  %v3676_v7 = vor.u32 %v4610_v55, %v3673_v18  ;;  %v5117_v34 = vpop.f32.mrf.mxu2  ;;  %v4019_v41 = vld [vmem:[#allocation8 + $0x1a0] sm:$0xf] }
  0xd4   :  { %1624 = vmatpush.bf16.msrb.mxu1 %v3324_v36  ;;  %v3908_v36 = vor.u32 %v4671_v27, %v3907_v26  ;;  %v4020_v46 = vor.u32 %v4699_v42, %v4019_v41  ;;  %v4179_v18 = vld [vmem:[#allocation8 + $0x2e0] sm:$0xf]  ;;  %v4053_v26 = vld [vmem:[#allocation8 + $0x1f0] sm:$0xf0]  ;;  %v3812_v27 = vor.u32 %v4647_v15, %v3811_v14  ;;  %v4701_v42 = vld [vmem:[#allocation8 + $0x1c4] sm:$0xf] }
  0xd5   :  { %1649 = vmatpush.bf16.msra.mxu2 %v3596_v33  ;;  %v1330_v33 = vadd.f32 %v5104_v16, %v328_v21  ;;  %v3875_v16 = vld [vmem:[#allocation8 + $0x80] sm:$0xf]  ;;  %v3925_v21 = vld [vmem:[#allocation8 + $0xf0] sm:$0xf0]  ;;  %v4653_v15 = vld [vmem:[#allocation8 + $0x44] sm:$0xf] }
  0xd6   :  { %1636 = vmatpush.bf16.msra.mxu3 %v3468_v32  ;;  %v4703_v32 = vld [vmem:[#allocation8 + $0x1cc] sm:$0xf0]  ;;  %v3876_v53 = vor.u32 %v4663_v44, %v3875_v16  ;;  %v4147_v44 = vld [vmem:[#allocation8 + $0x2a0] sm:$0xf] }
  0xd7   :  { %1663 = vmatpush.bf16.msra.mxu0 %v3708_v58  ;;  %v4036_v40 = vor.u32 %v4703_v32, %v4035_v29  ;;  %v1343_v43 = vadd.f32 %v5106_v25, %v1330_v33  ;;  %v3859_v25 = vld [vmem:[#allocation8 + $0x60] sm:$0xf] }
  0xd8   :  { %1625 = vmatpush.bf16.msrb.mxu1 %v3308_v52  ;;  %v3860_v59 = vor.u32 %v4659_v54, %v3859_v25  ;;  %v4131_v25 = vld [vmem:[#allocation8 + $0x280] sm:$0xf]  ;;  %v4727_v54 = vld [vmem:[#allocation8 + $0x28c] sm:$0xf0] }
  0xd9   :  { %1650 = vmatpush.bf16.msra.mxu2 %v3580_v49  ;;  %v4695_v49 = vld [vmem:[#allocation8 + $0x18c] sm:$0xf0]  ;;  %v1356_v50 = vadd.f32 %v5108_v31, %v1343_v43  ;;  %v4037_v43 = vld [vmem:[#allocation8 + $0x1d0] sm:$0xf0] }
  0xda   :  { %1637 = vmatpush.bf16.msra.mxu3 %v3452_v48  ;;  %v4003_v48 = vld [vmem:[#allocation8 + $0x180] sm:$0xf] }
  0xdb   :  { %1664 = vmatpush.bf16.msra.mxu0 %v3692_v13  ;;  %v1381_v47 = vpop.f32.mrf.mxu0  ;;  %v1409_v52 = vpop.f32.mrf.mxu2  ;;  %v1369_v58 = vadd.f32 %v5110_v37, %v1356_v50 }
  0xdc   :  { %1626 = vmatpush.bf16.msrb.mxu1 %v3292_v8  ;;  %v3827_v8 = vld [vmem:[#allocation8 + $0x20] sm:$0xf]  ;;  %v4021_v52 = vld [vmem:[#allocation8 + $0x1b0] sm:$0xf0] }
  0xdd   :  { %1651 = vmatpush.bf16.msra.mxu2 %v3564_v5  ;;  %v1382_v60 = vadd.f32 %v1381_v47, %v1369_v58  ;;  %v3844_v5 = vor.u32 %v4655_v62, %v3843_v61  ;;  %v3828_v13 = vor.u32 %v4651_v9, %v3827_v8  ;;  %v4665_v47 = vld [vmem:[#allocation8 + $0xa4] sm:$0xf]  ;;  %v4132_v58 = vor.u32 %v4727_v54, %v4131_v25 }
  0xde   :  { %1638 = vmatpush.bf16.msra.mxu3 %v3436_v4  ;;  %v4689_v9 = vld [vmem:[#allocation8 + $0x164] sm:$0xf] }
  0xdf   :  { %1627 = vmatmul.bf16.vlgmr.msrb.gmra.mxu1 %v5064_v51  ;;  %1665 = vmatpush.bf16.msra.mxu0 %v3676_v7  ;;  %v3892_v51 = vor.u32 %v4667_v39, %v3891_v38  ;;  %v4705_v7 = vld [vmem:[#allocation8 + $0x1e4] sm:$0xf]  ;;  %v3909_v39 = vld [vmem:[#allocation8 + $0xd0] sm:$0xf0] }
  0xe0   :  { %1678 = vmatpush.bf16.msra.mxu1 %v3804_v17  ;;  %v3956_v17 = vor.u32 %v4683_v12, %v3955_v11  ;;  %v4669_v38 = vld [vmem:[#allocation8 + $0xc4] sm:$0xf]  ;;  %v4099_v12 = vld [vmem:[#allocation8 + $0x240] sm:$0xf] }
  0xe1   :  { %1652 = vmatpush.bf16.msra.mxu2 %v3548_v23  ;;  %v4679_v23 = vld [vmem:[#allocation8 + $0x10c] sm:$0xf0]  ;;  %v3912_v16 = vor.u32 %v4669_v38, %v3909_v39  ;;  %v4645_v38 = vld [vmem:[#allocation8 + $0x4] sm:$0xf] }
  0xe2   :  { %1639 = vmatpush.bf16.msra.mxu3 %v3420_v22  ;;  %1666 = vmatmul.bf16.vlgmr.msra.gmra.mxu0 %v5082_v35  ;;  %v4691_v35 = vld [vmem:[#allocation8 + $0x16c] sm:$0xf0]  ;;  %v3939_v22 = vld [vmem:[#allocation8 + $0x100] sm:$0xf] }
  0xe3   :  { %v3988_v63 = vor.u32 %v4691_v35, %v3987_v56  ;;  %v1383_v3 = vpop.f32.mrf.mxu0  ;;  %v3940_v33 = vor.u32 %v4679_v23, %v3939_v22  ;;  %v3877_v56 = vld [vmem:[#allocation8 + $0x90] sm:$0xf0] }
  0xe4   :  { %2483 = vmatpush.bf16.msrb.mxu1 %v4052_v28  ;;  %1653 = vmatmul.bf16.vlgmr.msra.gmra.mxu2 %v5080_v30  ;;  %v4004_v30 = vor.u32 %v4695_v49, %v4003_v48  ;;  %v5125_v31 = vpop.f32.mrf.mxu3  ;;  %v3893_v48 = vld [vmem:[#allocation8 + $0xb0] sm:$0xf0]  ;;  %v4040_v49 = vor.u32 %v4701_v42, %v4037_v43  ;;  %v4711_v42 = vld [vmem:[#allocation8 + $0x20c] sm:$0xf0]  ;;  %v3931_v43 = vld [vmem:[#allocation8 + $0xe8] sm:$0xf] }
  0xe5   :  { %1640 = vmatmul.bf16.vlgmr.msra.gmra.mxu3 %v5068_v57  ;;  %v1394_v57 = vpop.f32.mrf.mxu1  ;;  %v1421_v14 = vadd.f32 %v5125_v31, %v329_v1 }
  0xe6   :  { %2470 = vmatpush.bf16.msrb.mxu3 %v3924_v24  ;;  %v1395_v37 = vadd.f32 %v1394_v57, %v1382_v60  ;;  %v4180_v24 = vor.u32 %v4739_v19, %v4179_v18  ;;  %v4697_v57 = vld [vmem:[#allocation8 + $0x1a4] sm:$0xf]  ;;  %v4005_v60 = vld [vmem:[#allocation8 + $0x190] sm:$0xf0] }
  0xe7   :  { %v5129_v6 = vpop.f32.mrf.mxu2  ;;  %v4024_v35 = vor.u32 %v4697_v57, %v4021_v52  ;;  %v4685_v19 = vld [vmem:[#allocation8 + $0x144] sm:$0xf] }
  0xe8   :  { %2484 = vmatpush.bf16.msrb.mxu1 %v4036_v40  ;;  %v1408_v55 = vadd.f32 %v5117_v34, %v1395_v37  ;;  %2496 = vmatpush.bf16.msrb.mxu2 %v4180_v24  ;;  %v4163_v34 = vld [vmem:[#allocation8 + $0x2c0] sm:$0xf]  ;;  %v4056_v40 = vor.u32 %v4705_v7, %v4053_v26  ;;  %v4715_v7 = vld [vmem:[#allocation8 + $0x22c] sm:$0xf0]  ;;  %v1434_v26 = vadd.f32 %v5129_v6, %v1421_v14  ;;  %v4059_v14 = vld [vmem:[#allocation8 + $0x1e8] sm:$0xf] }
  0xe9   :  { %v4083_v24 = vld [vmem:[#allocation8 + $0x220] sm:$0xf] }
  0xea   :  { %2471 = vmatpush.bf16.msrb.mxu3 %v3908_v36  ;;  %v1684_v29 = vmax.f32 %v1408_v55, 0.0  ;;  %v4735_v36 = vld [vmem:[#allocation8 + $0x2cc] sm:$0xf0]  ;;  %v3845_v55 = vld [vmem:[#allocation8 + $0x50] sm:$0xf0] }
  0xeb   :  { %v4164_v41 = vor.u32 %v4735_v36, %v4163_v34  ;;  %v3848_v23 = vor.u32 %v4653_v15, %v3845_v55  ;;  %v3957_v34 = vld [vmem:[#allocation8 + $0x130] sm:$0xf0]  ;;  %v4708_v15 = vld [vmem:[#allocation8 + $0x1f4] sm:$0xf0] }
  0xec   :  { %2485 = vmatpush.bf16.msrb.mxu1 %v4020_v46  ;;  %v1422_v20 = vpop.f32.mrf.mxu3  ;;  %v4731_v46 = vld [vmem:[#allocation8 + $0x2ac] sm:$0xf0] }
  0xed   :  { %v1396_v4 = vpop.f32.mrf.mxu1  ;;  %2497 = vmatpush.bf16.msrb.mxu2 %v4164_v41  ;;  %v4148_v50 = vor.u32 %v4731_v46, %v4147_v44  ;;  %v3973_v20 = vld [vmem:[#allocation8 + $0x150] sm:$0xf0]  ;;  %v4067_v41 = vld [vmem:[#allocation8 + $0x200] sm:$0xf]  ;;  %v4737_v44 = vld [vmem:[#allocation8 + $0x2e4] sm:$0xf] }
  0xee   :  { %2472 = vmatpush.bf16.msrb.mxu3 %v3892_v51  ;;  %v5132_v51 = vpack.c.bf16 %v1684_v29, %v1684_v29  ;;  %v4657_v4 = vld [vmem:[#allocation8 + $0x64] sm:$0xf]  ;;  %v3976_v31 = vor.u32 %v4685_v19, %v3973_v20  ;;  %v4068_v6 = vor.u32 %v4711_v42, %v4067_v41  ;;  %v4181_v46 = vld [vmem:[#allocation8 + $0x2f0] sm:$0xf0]  ;;  %v4664_v19 = vld [vmem:[#allocation8 + $0x94] sm:$0xf0] }
  0xef   :  { %3808 = vmatmul.msk.bf16.vlgmr.msra.gmra.mxu1 %vm1316_vm0, %v5076_v45  ;;  %v4673_v45 = vld [vmem:[#allocation8 + $0xe4] sm:$0xf]  ;;  %v1435_v28 = vpop.f32.mrf.mxu2  ;;  %v4184_v57 = vor.u32 %v4737_v44, %v4181_v46  ;;  %v4259_v42 = vld [vmem:[#allocation8 + $0x380] sm:$0xf] }
  0xf0   :  { %2486 = vmatpush.bf16.msrb.mxu1 %v4004_v30  ;;  %v3928_v32 = vor.u32 %v4673_v45, %v3925_v21  ;;  %v4661_v30 = vld [vmem:[#allocation8 + $0x84] sm:$0xf]  ;;  %v3829_v28 = vld [vmem:[#allocation8 + $0x30] sm:$0xf0] }
  0xf1   :  { %2498 = vmatpush.bf16.msrb.mxu2 %v4148_v50  ;;  %v3880_v62 = vor.u32 %v4661_v30, %v3877_v56  ;;  %v3941_v50 = vld [vmem:[#allocation8 + $0x110] sm:$0xf0]  ;;  %v3915_v56 = vld [vmem:[#allocation8 + $0xc8] sm:$0xf]  ;;  %v4725_v20 = vld [vmem:[#allocation8 + $0x284] sm:$0xf] }
  0xf2   :  { %2473 = vmatpush.bf16.msrb.mxu3 %v3876_v53  ;;  %v3896_v53 = vor.u32 %v4665_v47, %v3893_v48  ;;  %v4676_v48 = vld [vmem:[#allocation8 + $0xf4] sm:$0xf0] }
  0xf3   :  { %v3932_v30 = vor.u32 %v4676_v48, %v3931_v43  ;;  %v4759_v43 = vld [vmem:[#allocation8 + $0x38c] sm:$0xf0]  ;;  %v3851_v48 = vld [vmem:[#allocation8 + $0x48] sm:$0xf] }
  0xf4   :  { %2487 = vmatpush.bf16.msrb.mxu1 %v3988_v63  ;;  %v4115_v63 = vld [vmem:[#allocation8 + $0x260] sm:$0xf]  ;;  %v4260_v44 = vor.u32 %v4759_v43, %v4259_v42  ;;  %v4769_v42 = vld [vmem:[#allocation8 + $0x3e4] sm:$0xf]  ;;  %v4309_v43 = vld [vmem:[#allocation8 + $0x3f0] sm:$0xf0] }
  0xf5   :  { %2499 = vmatpush.bf16.msrb.mxu2 %v4132_v58  ;;  %v4116_v8 = vor.u32 %v4723_v0, %v4115_v63  ;;  %v4733_v58 = vld [vmem:[#allocation8 + $0x2c4] sm:$0xf]  ;;  %v4771_v63 = vld [vmem:[#allocation8 + $0x3ec] sm:$0xf0] }
  0xf6   :  { %2474 = vmatpush.bf16.msrb.mxu3 %v3860_v59  ;;  %v4693_v59 = vld [vmem:[#allocation8 + $0x184] sm:$0xf] }
  0xf7   :  { %v4008_v37 = vor.u32 %v4693_v59, %v4005_v60  ;;  %v4165_v59 = vld [vmem:[#allocation8 + $0x2d0] sm:$0xf0]  ;;  %v4672_v60 = vld [vmem:[#allocation8 + $0xd4] sm:$0xf0] }
  0xf8   :  { %2488 = vmatpush.bf16.msrb.mxu1 %v3972_v10  ;;  %v3989_v10 = vld [vmem:[#allocation8 + $0x170] sm:$0xf0] }
  0xf9   :  { %2500 = vmatpush.bf16.msrb.mxu2 %v4116_v8  ;;  %v3992_v45 = vor.u32 %v4689_v9, %v3989_v10  ;;  %v4668_v9 = vld [vmem:[#allocation8 + $0xb4] sm:$0xf0] }
  0xfa   :  { %2475 = vmatpush.bf16.msrb.mxu3 %v3844_v5  ;;  %v3861_v5 = vld [vmem:[#allocation8 + $0x70] sm:$0xf0] }
  0xfb   :  { %v1446_v61 = vpop.f32.mrf.mxu0  ;;  %v3864_v11 = vor.u32 %v4657_v4, %v3861_v5  ;;  %v3899_v4 = vld [vmem:[#allocation8 + $0xa8] sm:$0xf]  ;;  %v4729_v5 = vld [vmem:[#allocation8 + $0x2a4] sm:$0xf] }
  0xfc   :  { %2489 = vmatpush.bf16.msrb.mxu1 %v3956_v17  ;;  %v1459_v3 = vpop.f32.mrf.mxu1  ;;  %v1447_v36 = vadd.f32 %v1446_v61, %v1434_v26  ;;  %v4168_v61 = vor.u32 %v4733_v58, %v4165_v59  ;;  %v4043_v26 = vld [vmem:[#allocation8 + $0x1c8] sm:$0xf] }
  0xfd   :  { %v3835_v59 = vld [vmem:[#allocation8 + $0x28] sm:$0xf] }
  0xfe   :  { %2476 = vmatpush.bf16.msrb.mxu3 %v3828_v13  ;;  %v4719_v13 = vld [vmem:[#allocation8 + $0x24c] sm:$0xf0]  ;;  %v1460_v52 = vadd.f32 %v1459_v3, %v1447_v36  ;;  %v3916_v3 = vor.u32 %v4672_v60, %v3915_v56  ;;  %v4696_v56 = vld [vmem:[#allocation8 + $0x194] sm:$0xf0]  ;;  %v4713_v60 = vld [vmem:[#allocation8 + $0x224] sm:$0xf] }
  0xff   :  { %v4100_v17 = vor.u32 %v4719_v13, %v4099_v12  ;;  %v4767_v12 = vld [vmem:[#allocation8 + $0x3cc] sm:$0xf0] }
 0x100   :  { %2490 = vmatpush.bf16.msrb.mxu1 %v3940_v33  ;;  %v4681_v33 = vld [vmem:[#allocation8 + $0x124] sm:$0xf] }
 0x101   :  { %2501 = vmatpush.bf16.msrb.mxu2 %v4100_v17 }
 0x102   :  { %2477 = vmatpush.bf16.msrb.mxu3 %v3812_v27  ;;  %v4649_v27 = vld [vmem:[#allocation8 + $0x24] sm:$0xf] }
 0x103   :  { %v1448_v21 = vpop.f32.mrf.mxu0  ;;  %v3832_v39 = vor.u32 %v4649_v27, %v3829_v28  ;;  %v4704_v27 = vld [vmem:[#allocation8 + $0x1d4] sm:$0xf0] }
 0x104   :  { %2535 = vmatpush.bf16.msra.mxu1 %v4056_v40  ;;  %v1472_v18 = vpop.f32.mrf.mxu3  ;;  %v1461_v29 = vpop.f32.mrf.mxu1  ;;  %v3813_v40 = vld [vmem:[#allocation8 + $0x10] sm:$0xf0]  ;;  %v4060_v21 = vor.u32 %v4708_v15, %v4059_v14  ;;  %v4648_v14 = vld [vmem:[#allocation8 + $0x14] sm:$0xf0]  ;;  %v4709_v15 = vld [vmem:[#allocation8 + $0x204] sm:$0xf] }
 0x105   :  { %2478 = vmatmul.bf16.vlgmr.msrb.gmra.mxu3 %v5132_v51  ;;  %v1473_v54 = vadd.f32 %v1472_v18, %v1460_v52  ;;  %v3900_v18 = vor.u32 %v4668_v9, %v3899_v4  ;;  %v4656_v52 = vld [vmem:[#allocation8 + $0x54] sm:$0xf0]  ;;  %v4227_v4 = vld [vmem:[#allocation8 + $0x340] sm:$0xf] }
 0x106   :  { %2522 = vmatpush.bf16.msra.mxu3 %v3928_v32  ;;  %v4084_v32 = vor.u32 %v4715_v7, %v4083_v24  ;;  %v4763_v24 = vld [vmem:[#allocation8 + $0x3ac] sm:$0xf0]  ;;  %v3852_v58 = vor.u32 %v4656_v52, %v3851_v48  ;;  %v3901_v52 = vld [vmem:[#allocation8 + $0xb8] sm:$0xf0] }
 0x107   :  { %v1485_v22 = vpop.f32.mrf.mxu2 }
 0x108   :  { %2536 = vmatpush.bf16.msra.mxu1 %v4040_v49  ;;  %2502 = vmatpush.bf16.msrb.mxu2 %v4084_v32  ;;  %v4677_v49 = vld [vmem:[#allocation8 + $0x104] sm:$0xf]  ;;  %v1486_v1 = vadd.f32 %v1485_v22, %v1473_v54  ;;  %v4133_v22 = vld [vmem:[#allocation8 + $0x290] sm:$0xf0]  ;;  %v3867_v32 = vld [vmem:[#allocation8 + $0x68] sm:$0xf] }
 0x109   :  { %v4136_v28 = vor.u32 %v4725_v20, %v4133_v22  ;;  %v4755_v54 = vld [vmem:[#allocation8 + $0x36c] sm:$0xf0]  ;;  %v4674_v22 = vld [vmem:[#allocation8 + $0xec] sm:$0xf] }
 0x10a   :  { %2523 = vmatpush.bf16.msra.mxu3 %v3912_v16  ;;  %v3960_v16 = vor.u32 %v4681_v33, %v3957_v34  ;;  %v4721_v33 = vld [vmem:[#allocation8 + $0x264] sm:$0xf]  ;;  %v4117_v34 = vld [vmem:[#allocation8 + $0x270] sm:$0xf0]  ;;  %v4747_v20 = vld [vmem:[#allocation8 + $0x32c] sm:$0xf0] }
 0x10b   :  { %v4120_v41 = vor.u32 %v4721_v33, %v4117_v34 }
 0x10c   :  { %2537 = vmatpush.bf16.msra.mxu1 %v4024_v35  ;;  %v1474_v47 = vpop.f32.mrf.mxu3  ;;  %2503 = vmatpush.bf16.msrb.mxu2 %v4068_v6  ;;  %v3944_v35 = vor.u32 %v4677_v49, %v3941_v50  ;;  %v4700_v6 = vld [vmem:[#allocation8 + $0x1b4] sm:$0xf0]  ;;  %v4717_v49 = vld [vmem:[#allocation8 + $0x244] sm:$0xf]  ;;  %v4101_v50 = vld [vmem:[#allocation8 + $0x250] sm:$0xf0] }
 0x10e   :  { %2524 = vmatpush.bf16.msra.mxu3 %v3896_v53  ;;  %v3816_v53 = vor.u32 %v4645_v38, %v3813_v40  ;;  %v4660_v40 = vld [vmem:[#allocation8 + $0x74] sm:$0xf0] }
 0x10f   :  { %v1487_v25 = vpop.f32.mrf.mxu2  ;;  %v3868_v47 = vor.u32 %v4660_v40, %v3867_v32  ;;  %v4670_v32 = vld [vmem:[#allocation8 + $0xcc] sm:$0xf]  ;;  %v3917_v40 = vld [vmem:[#allocation8 + $0xd8] sm:$0xf0] }
 0x110   :  { %2538 = vmatpush.bf16.msra.mxu1 %v4008_v37  ;;  %2548 = vmatpush.bf16.msra.mxu2 %v4184_v57  ;;  %v4149_v37 = vld [vmem:[#allocation8 + $0x2b0] sm:$0xf0]  ;;  %v4243_v25 = vld [vmem:[#allocation8 + $0x360] sm:$0xf]  ;;  %v3920_v48 = vor.u32 %v4670_v32, %v3917_v40  ;;  %v3837_v40 = vld [vmem:[#allocation8 + $0x38] sm:$0xf0] }
 0x111   :  { %v4152_v10 = vor.u32 %v4729_v5, %v4149_v37  ;;  %v4751_v5 = vld [vmem:[#allocation8 + $0x34c] sm:$0xf0]  ;;  %v3995_v37 = vld [vmem:[#allocation8 + $0x168] sm:$0xf] }
 0x112   :  { %2525 = vmatpush.bf16.msra.mxu3 %v3880_v62  ;;  %v4307_v62 = vld [vmem:[#allocation8 + $0x3e0] sm:$0xf]  ;;  %v4228_v9 = vor.u32 %v4751_v5, %v4227_v4  ;;  %v4702_v5 = vld [vmem:[#allocation8 + $0x1cc] sm:$0xf] }
 0x113   :  { %v4308_v0 = vor.u32 %v4771_v63, %v4307_v62 }
 0x114   :  { %2539 = vmatpush.bf16.msra.mxu1 %v3992_v45  ;;  %2549 = vmatpush.bf16.msra.mxu2 %v4168_v61  ;;  %v1498_v8 = vpop.f32.mrf.mxu3  ;;  %v3883_v45 = vld [vmem:[#allocation8 + $0x88] sm:$0xf]  ;;  %v4085_v61 = vld [vmem:[#allocation8 + $0x230] sm:$0xf0] }
 0x115   :  { %2509 = vmatpush.bf16.msrb.mxu0 %v4308_v0  ;;  %v1499_v13 = vadd.f32 %v1498_v8, %v1486_v1  ;;  %v3884_v29 = vor.u32 %v4664_v19, %v3883_v45  ;;  %v4652_v1 = vld [vmem:[#allocation8 + $0x34] sm:$0xf0]  ;;  %v4211_v19 = vld [vmem:[#allocation8 + $0x320] sm:$0xf] }
 0x116   :  { %2526 = vmatpush.bf16.msra.mxu3 %v3864_v11  ;;  %v4291_v11 = vld [vmem:[#allocation8 + $0x3c0] sm:$0xf]  ;;  %v4692_v8 = vld [vmem:[#allocation8 + $0x174] sm:$0xf0] }
 0x117   :  { %v4292_v55 = vor.u32 %v4767_v12, %v4291_v11  ;;  %v1685_v17 = vmax.f32 %v1499_v13, 0.0  ;;  %v3819_v11 = vld [vmem:[#allocation8 + $0x8] sm:$0xf]  ;;  %v3836_v13 = vor.u32 %v4652_v1, %v3835_v59  ;;  %v3996_v45 = vor.u32 %v4692_v8, %v3995_v37  ;;  %v4761_v1 = vld [vmem:[#allocation8 + $0x3a4] sm:$0xf] }
 0x118   :  { %2540 = vmatpush.bf16.msra.mxu1 %v3976_v31  ;;  %2550 = vmatpush.bf16.msra.mxu2 %v4152_v10 }
 0x119   :  { %2510 = vmatpush.bf16.msrb.mxu0 %v4292_v55  ;;  %v5139_v7 = vpack.c.bf16 %v1685_v17, %v1685_v17  ;;  %v4069_v55 = vld [vmem:[#allocation8 + $0x210] sm:$0xf0]  ;;  %v3979_v17 = vld [vmem:[#allocation8 + $0x148] sm:$0xf] }
 0x11a   :  { %2527 = vmatpush.bf16.msra.mxu3 %v3848_v23  ;;  %v4275_v23 = vld [vmem:[#allocation8 + $0x3a0] sm:$0xf] }
 0x11b   :  { %v4276_v31 = vor.u32 %v4763_v24, %v4275_v23  ;;  %2491 = vmatmul.bf16.vlgmr.msrb.gmra.mxu1 %v5139_v7  ;;  %v5142_v38 = vpop.f32.mrf.mxu0  ;;  %v3933_v23 = vld [vmem:[#allocation8 + $0xf8] sm:$0xf0]  ;;  %v4212_v24 = vor.u32 %v4747_v20, %v4211_v19  ;;  %v4654_v19 = vld [vmem:[#allocation8 + $0x4c] sm:$0xf] }
 0x11c   :  { %2541 = vmatpush.bf16.msra.mxu1 %v3960_v16  ;;  %v1500_v36 = vpop.f32.mrf.mxu3  ;;  %2551 = vmatpush.bf16.msra.mxu2 %v4136_v28  ;;  %v4027_v16 = vld [vmem:[#allocation8 + $0x1a8] sm:$0xf]  ;;  %v5144_v46 = vpop.f32.mrf.mxu1  ;;  %v4684_v28 = vld [vmem:[#allocation8 + $0x134] sm:$0xf0] }
 0x11d   :  { %2511 = vmatpush.bf16.msrb.mxu0 %v4276_v31  ;;  %v4028_v57 = vor.u32 %v4700_v6, %v4027_v16  ;;  %v4195_v36 = vld [vmem:[#allocation8 + $0x300] sm:$0xf]  ;;  %v330_v16 = vperm.slane %v5112_v2, 2 }
 0x11e   :  { %2528 = vmatpush.bf16.msra.mxu3 %v3832_v39  ;;  %v4044_v39 = vor.u32 %v4704_v27, %v4043_v26  ;;  %v3820_v26 = vor.u32 %v4648_v14, %v3819_v11  ;;  %v3963_v27 = vld [vmem:[#allocation8 + $0x128] sm:$0xf]  ;;  %v4658_v11 = vld [vmem:[#allocation8 + $0x6c] sm:$0xf]  ;;  %v4757_v14 = vld [vmem:[#allocation8 + $0x384] sm:$0xf] }
 0x120   :  { %2542 = vmatpush.bf16.msra.mxu1 %v3944_v35  ;;  %2552 = vmatpush.bf16.msra.mxu2 %v4120_v41  ;;  %v4244_v35 = vor.u32 %v4755_v54, %v4243_v25  ;;  %v4293_v25 = vld [vmem:[#allocation8 + $0x3d0] sm:$0xf0]  ;;  %v1512_v54 = vadd.f32 %v5144_v46, %v330_v16  ;;  %v4045_v46 = vld [vmem:[#allocation8 + $0x1d8] sm:$0xf0]  ;;  %v4690_v16 = vld [vmem:[#allocation8 + $0x16c] sm:$0xf] }
 0x121   :  { %2512 = vmatpush.bf16.msrb.mxu0 %v4260_v44  ;;  %v4312_v44 = vor.u32 %v4769_v42, %v4309_v43  ;;  %v4229_v42 = vld [vmem:[#allocation8 + $0x350] sm:$0xf0] }
 0x122   :  { %2529 = vmatpush.bf16.msra.mxu3 %v3816_v53  ;;  %v4104_v53 = vor.u32 %v4717_v49, %v4101_v50  ;;  %v3947_v49 = vld [vmem:[#allocation8 + $0x108] sm:$0xf]  ;;  %v4680_v50 = vld [vmem:[#allocation8 + $0x114] sm:$0xf0] }
 0x123   :  { %v1539_v63 = vpop.f32.mrf.mxu0 }
 0x124   :  { %2587 = vmatpush.bf16.msrb.mxu1 %v4060_v21  ;;  %2553 = vmatpush.bf16.msra.mxu2 %v4104_v53  ;;  %v1513_v12 = vpop.f32.mrf.mxu1  ;;  %v4688_v21 = vld [vmem:[#allocation8 + $0x154] sm:$0xf0]  ;;  %v4765_v53 = vld [vmem:[#allocation8 + $0x3c4] sm:$0xf] }
 0x125   :  { %2530 = vmatmul.bf16.vlgmr.msra.gmra.mxu3 %v5132_v51  ;;  %2513 = vmatpush.bf16.msrb.mxu0 %v4244_v35  ;;  %v3980_v31 = vor.u32 %v4688_v21, %v3979_v17  ;;  %v4296_v35 = vor.u32 %v4765_v53, %v4293_v25  ;;  %v4048_v12 = vor.u32 %v4702_v5, %v4045_v46  ;;  %v4029_v17 = vld [vmem:[#allocation8 + $0x1b8] sm:$0xf0]  ;;  %v4745_v25 = vld [vmem:[#allocation8 + $0x324] sm:$0xf]  ;;  %v4197_v5 = vld [vmem:[#allocation8 + $0x310] sm:$0xf0] }
 0x126   :  { %2574 = vmatpush.bf16.msrb.mxu3 %v3932_v30  ;;  %v4011_v30 = vld [vmem:[#allocation8 + $0x188] sm:$0xf]  ;;  %v3853_v21 = vld [vmem:[#allocation8 + $0x58] sm:$0xf0]  ;;  %v4682_v46 = vld [vmem:[#allocation8 + $0x12c] sm:$0xf] }
 0x127   :  { %v4012_v0 = vor.u32 %v4696_v56, %v4011_v30  ;;  %v5148_v10 = vpop.f32.mrf.mxu2  ;;  %v4706_v30 = vld [vmem:[#allocation8 + $0x1ec] sm:$0xf]  ;;  %v4061_v56 = vld [vmem:[#allocation8 + $0x1f8] sm:$0xf0] }
 0x128   :  { %2588 = vmatpush.bf16.msrb.mxu1 %v4044_v39  ;;  %v5146_v62 = vpop.f32.mrf.mxu3  ;;  %v4743_v39 = vld [vmem:[#allocation8 + $0x30c] sm:$0xf0]  ;;  %v4064_v63 = vor.u32 %v4706_v30, %v4061_v56  ;;  %v3821_v53 = vld [vmem:[#allocation8 + $0x18] sm:$0xf0]  ;;  %v4686_v56 = vld [vmem:[#allocation8 + $0x14c] sm:$0xf] }
 0x129   :  { %2514 = vmatpush.bf16.msrb.mxu0 %v4228_v9  ;;  %v4196_v41 = vor.u32 %v4743_v39, %v4195_v36  ;;  %v1525_v4 = vadd.f32 %v5146_v62, %v1512_v54  ;;  %v4213_v54 = vld [vmem:[#allocation8 + $0x330] sm:$0xf0] }
 0x12a   :  { %2575 = vmatpush.bf16.msrb.mxu3 %v3916_v3  ;;  %v4088_v3 = vor.u32 %v4713_v60, %v4085_v61  ;;  %v4662_v60 = vld [vmem:[#allocation8 + $0x8c] sm:$0xf] }
 0x12b   :  { %2543 = vmatmul.bf16.vlgmr.msra.gmra.mxu1 %v5139_v7  ;;  %v5151_v34 = vpop.f32.mrf.mxu0 }
 0x12c   :  { %2589 = vmatpush.bf16.msrb.mxu1 %v4028_v57  ;;  %2554 = vmatpush.bf16.msra.mxu2 %v4088_v3  ;;  %v4666_v57 = vld [vmem:[#allocation8 + $0xac] sm:$0xf]  ;;  %v4277_v3 = vld [vmem:[#allocation8 + $0x3b0] sm:$0xf0] }
 0x12d   :  { %2515 = vmatpush.bf16.msrb.mxu0 %v4212_v24  ;;  %v3904_v59 = vor.u32 %v4666_v57, %v3901_v52  ;;  %v4280_v37 = vor.u32 %v4761_v1, %v4277_v3  ;;  %v4646_v57 = vld [vmem:[#allocation8 + $0xc] sm:$0xf] }
 0x12e   :  { %2576 = vmatpush.bf16.msrb.mxu3 %v3900_v18  ;;  %v4072_v18 = vor.u32 %v4709_v15, %v4069_v55  ;;  %v4261_v15 = vld [vmem:[#allocation8 + $0x390] sm:$0xf0]  ;;  %v1538_v55 = vadd.f32 %v5142_v38, %v1525_v4  ;;  %v4741_v4 = vld [vmem:[#allocation8 + $0x304] sm:$0xf] }
 0x12f   :  { %v1552_v6 = vpop.f32.mrf.mxu2  ;;  %v4264_v62 = vor.u32 %v4757_v14, %v4261_v15  ;;  %v4678_v15 = vld [vmem:[#allocation8 + $0x10c] sm:$0xf] }
 0x130   :  { %2590 = vmatpush.bf16.msrb.mxu1 %v4012_v0  ;;  %v1526_v33 = vpop.f32.mrf.mxu3  ;;  %2555 = vmatpush.bf16.msra.mxu2 %v4072_v18  ;;  %v3885_v0 = vld [vmem:[#allocation8 + $0x98] sm:$0xf0]  ;;  %v1551_v24 = vadd.f32 %v5148_v10, %v1538_v55 }
 0x131   :  { %2516 = vmatpush.bf16.msrb.mxu0 %v4196_v41  ;;  %v3888_v9 = vor.u32 %v4662_v60, %v3885_v0  ;;  %v4650_v33 = vld [vmem:[#allocation8 + $0x2c] sm:$0xf]  ;;  %v4749_v41 = vld [vmem:[#allocation8 + $0x344] sm:$0xf]  ;;  %v3997_v10 = vld [vmem:[#allocation8 + $0x178] sm:$0xf0] }
 0x132   :  { %2577 = vmatpush.bf16.msrb.mxu3 %v3884_v29  ;;  %v3936_v29 = vor.u32 %v4674_v22, %v3933_v23  ;;  %v4753_v22 = vld [vmem:[#allocation8 + $0x364] sm:$0xf]  ;;  %v4245_v23 = vld [vmem:[#allocation8 + $0x370] sm:$0xf0]  ;;  %v4000_v52 = vor.u32 %v4690_v16, %v3997_v10  ;;  %v4736_v0 = vld [vmem:[#allocation8 + $0x2d4] sm:$0xf0] }
 0x133   :  { %v1591_v61 = vpop.f32.mrf.mxu0  ;;  %v4248_v38 = vor.u32 %v4753_v22, %v4245_v23  ;;  %v3949_v55 = vld [vmem:[#allocation8 + $0x118] sm:$0xf0]  ;;  %v4724_v22 = vld [vmem:[#allocation8 + $0x274] sm:$0xf0]  ;;  %v4738_v10 = vld [vmem:[#allocation8 + $0x2ec] sm:$0xf] }
 0x134   :  { %2591 = vmatpush.bf16.msrb.mxu1 %v3996_v45  ;;  %v4698_v45 = vld [vmem:[#allocation8 + $0x1ac] sm:$0xf] }
 0x135   :  { %2561 = vmatpush.bf16.msra.mxu0 %v4312_v44  ;;  %v4032_v20 = vor.u32 %v4698_v45, %v4029_v17  ;;  %v4232_v44 = vor.u32 %v4749_v41, %v4229_v42  ;;  %v4139_v17 = vld [vmem:[#allocation8 + $0x288] sm:$0xf] }
 0x136   :  { %2578 = vmatpush.bf16.msrb.mxu3 %v3868_v47  ;;  %v3964_v47 = vor.u32 %v4684_v28, %v3963_v27  ;;  %v4013_v27 = vld [vmem:[#allocation8 + $0x198] sm:$0xf0] }
 0x138   :  { %2592 = vmatpush.bf16.msrb.mxu1 %v3980_v31 }
 0x139   :  { %2562 = vmatpush.bf16.msra.mxu0 %v4296_v35  ;;  %v3981_v35 = vld [vmem:[#allocation8 + $0x158] sm:$0xf0] }
 0x13a   :  { %2579 = vmatpush.bf16.msrb.mxu3 %v3852_v58  ;;  %v3948_v58 = vor.u32 %v4680_v50, %v3947_v49  ;;  %v4187_v49 = vld [vmem:[#allocation8 + $0x2e8] sm:$0xf]  ;;  %v4740_v50 = vld [vmem:[#allocation8 + $0x2f4] sm:$0xf0]  ;;  %v3984_v1 = vor.u32 %v4686_v56, %v3981_v35 }
 0x13b   :  { %v4188_v60 = vor.u32 %v4740_v50, %v4187_v49  ;;  %v4734_v50 = vld [vmem:[#allocation8 + $0x2cc] sm:$0xf] }
 0x13c   :  { %2593 = vmatpush.bf16.msrb.mxu1 %v3964_v47  ;;  %v1563_v8 = vpop.f32.mrf.mxu1 }
 0x13d   :  { %2563 = vmatpush.bf16.msra.mxu0 %v4280_v37  ;;  %v1564_v31 = vadd.f32 %v1563_v8, %v1551_v24  ;;  %v3965_v37 = vld [vmem:[#allocation8 + $0x138] sm:$0xf0] }
 0x13e   :  { %2580 = vmatpush.bf16.msrb.mxu3 %v3836_v13  ;;  %v3869_v13 = vld [vmem:[#allocation8 + $0x78] sm:$0xf0]  ;;  %v3968_v14 = vor.u32 %v4682_v46, %v3965_v37  ;;  %v4283_v37 = vld [vmem:[#allocation8 + $0x3a8] sm:$0xf] }
 0x13f   :  { %v3872_v18 = vor.u32 %v4658_v11, %v3869_v13  ;;  %v5160_v28 = vpop.f32.mrf.mxu0  ;;  %v4732_v13 = vld [vmem:[#allocation8 + $0x2b4] sm:$0xf0]  ;;  %v4141_v46 = vld [vmem:[#allocation8 + $0x298] sm:$0xf0] }
 0x140   :  { %2594 = vmatpush.bf16.msrb.mxu1 %v3948_v58 }
 0x141   :  { %2564 = vmatpush.bf16.msra.mxu0 %v4264_v62  ;;  %v4728_v62 = vld [vmem:[#allocation8 + $0x294] sm:$0xf0] }
 0x142   :  { %2581 = vmatpush.bf16.msrb.mxu3 %v3820_v26  ;;  %v4694_v26 = vld [vmem:[#allocation8 + $0x18c] sm:$0xf] }
 0x143   :  { %2595 = vmatmul.bf16.vlgmr.msrb.gmra.mxu1 %v5139_v7  ;;  %v4016_v39 = vor.u32 %v4694_v26, %v4013_v27  ;;  %v4107_v27 = vld [vmem:[#allocation8 + $0x248] sm:$0xf] }
 0x144   :  { %2639 = vmatpush.bf16.msra.mxu1 %v4064_v63  ;;  %v1565_v32 = vpop.f32.mrf.mxu1  ;;  %v4171_v63 = vld [vmem:[#allocation8 + $0x2c8] sm:$0xf] }
 0x145   :  { %2582 = vmatmul.bf16.vlgmr.msrb.gmra.mxu3 %v5132_v51  ;;  %2565 = vmatpush.bf16.msra.mxu0 %v4248_v38  ;;  %v4172_v11 = vor.u32 %v4736_v0, %v4171_v63  ;;  %v4716_v32 = vld [vmem:[#allocation8 + $0x234] sm:$0xf0]  ;;  %v4299_v63 = vld [vmem:[#allocation8 + $0x3c8] sm:$0xf] }
 0x146   :  { %2626 = vmatpush.bf16.msra.mxu3 %v3936_v29  ;;  %v3856_v29 = vor.u32 %v4654_v19, %v3853_v21  ;;  %v3952_v19 = vor.u32 %v4678_v15, %v3949_v55  ;;  %v4123_v21 = vld [vmem:[#allocation8 + $0x268] sm:$0xf]  ;;  %v4768_v0 = vld [vmem:[#allocation8 + $0x3d4] sm:$0xf0] }
 0x147   :  { %v1602_v6 = vpop.f32.mrf.mxu2  ;;  %v1617_v58 = vpop.f32.mrf.mxu0  ;;  %v4124_v26 = vor.u32 %v4724_v22, %v4123_v21  ;;  %v4760_v15 = vld [vmem:[#allocation8 + $0x394] sm:$0xf0]  ;;  %v4714_v22 = vld [vmem:[#allocation8 + $0x22c] sm:$0xf] }
 0x148   :  { %2640 = vmatpush.bf16.msra.mxu1 %v4048_v12  ;;  %v1576_v36 = vpop.f32.mrf.mxu3  ;;  %v4155_v12 = vld [vmem:[#allocation8 + $0x2a8] sm:$0xf] }
 0x149   :  { %v1577_v43 = vadd.f32 %v1576_v36, %v1564_v31  ;;  %2566 = vmatpush.bf16.msra.mxu0 %v4232_v44  ;;  %v4156_v45 = vor.u32 %v4732_v13, %v4155_v12  ;;  %v4722_v12 = vld [vmem:[#allocation8 + $0x26c] sm:$0xf]  ;;  %v4125_v13 = vld [vmem:[#allocation8 + $0x278] sm:$0xf0] }
 0x14a   :  { %2627 = vmatpush.bf16.msra.mxu3 %v3920_v48  ;;  %v3840_v48 = vor.u32 %v4650_v33, %v3837_v40  ;;  %v4128_v55 = vor.u32 %v4722_v12, %v4125_v13 }
 0x14b   :  { %v1590_v47 = vadd.f32 %v5151_v34, %v1577_v43  ;;  %v3824_v34 = vor.u32 %v4646_v57, %v3821_v53  ;;  %v4075_v43 = vld [vmem:[#allocation8 + $0x208] sm:$0xf]  ;;  %v4173_v57 = vld [vmem:[#allocation8 + $0x2d8] sm:$0xf0] }
 0x14c   :  { %2641 = vmatpush.bf16.msra.mxu1 %v4032_v20  ;;  %v4140_v20 = vor.u32 %v4728_v62, %v4139_v17  ;;  %v4176_v35 = vor.u32 %v4734_v50, %v4173_v57  ;;  %v4718_v17 = vld [vmem:[#allocation8 + $0x24c] sm:$0xf]  ;;  %v4109_v62 = vld [vmem:[#allocation8 + $0x258] sm:$0xf0]  ;;  %v5178_v57 = vld [vmem:[#allocation10] sm:$0xf] }
 0x14d   :  { %v1686_v30 = vmax.f32 %v1590_v47, 0.0  ;;  %v4269_v50 = vld [vmem:[#allocation8 + $0x398] sm:$0xf0] }
 0x14e   :  { %2628 = vmatpush.bf16.msra.mxu3 %v3904_v59  ;;  %v4216_v59 = vor.u32 %v4745_v25, %v4213_v54  ;;  %v4315_v25 = vld [vmem:[#allocation8 + $0x3e8] sm:$0xf]  ;;  %v4772_v54 = vld [vmem:[#allocation8 + $0x3f4] sm:$0xf0] }
 0x14f   :  { %v5163_v61 = vpack.c.bf16 %v1686_v30, %v1686_v30  ;;  %v1604_v8 = vpop.f32.mrf.mxu2  ;;  %v4316_v58 = vor.u32 %v4772_v54, %v4315_v25  ;;  %v4253_v25 = vld [vmem:[#allocation8 + $0x378] sm:$0xf0] }
 0x150   :  { %2642 = vmatpush.bf16.msra.mxu1 %v4016_v39  ;;  %v1578_v3 = vpop.f32.mrf.mxu3  ;;  %2567 = vmatpush.bf16.msra.mxu0 %v4216_v59  ;;  %v4730_v59 = vld [vmem:[#allocation8 + $0x2ac] sm:$0xf]  ;;  %v4764_v8 = vld [vmem:[#allocation8 + $0x3b4] sm:$0xf0] }
 0x151   :  { %2504 = vmatmul.bf16.vlgmr.msrb.gmra.mxu2 %v5163_v61 }
 0x152   :  { %2629 = vmatpush.bf16.msra.mxu3 %v3888_v9  ;;  %v4200_v9 = vor.u32 %v4741_v4, %v4197_v5  ;;  %2600 = vmatpush.bf16.msrb.mxu2 %v4188_v60  ;;  %v4157_v60 = vld [vmem:[#allocation8 + $0x2b8] sm:$0xf0]  ;;  %v4300_v4 = vor.u32 %v4768_v0, %v4299_v63  ;;  %v4726_v5 = vld [vmem:[#allocation8 + $0x28c] sm:$0xf] }
 0x153   :  { %v4746_v0 = vld [vmem:[#allocation8 + $0x32c] sm:$0xf] }
 0x154   :  { %2643 = vmatpush.bf16.msra.mxu1 %v4000_v52  ;;  %2568 = vmatpush.bf16.msra.mxu0 %v4200_v9  ;;  %v4144_v9 = vor.u32 %v4726_v5, %v4141_v46  ;;  %v4205_v5 = vld [vmem:[#allocation8 + $0x318] sm:$0xf0] }
 0x156   :  { %2630 = vmatpush.bf16.msra.mxu3 %v3872_v18  ;;  %2601 = vmatpush.bf16.msrb.mxu2 %v4172_v11  ;;  %v331_v18 = vperm.slane %v5112_v2, 3  ;;  %v4284_v11 = vor.u32 %v4764_v8, %v4283_v37 }
 0x158   :  { %2644 = vmatpush.bf16.msra.mxu1 %v3984_v1  ;;  %v1603_v23 = vadd.f32 %v1602_v6, %v331_v18  ;;  %v4189_v6 = vld [vmem:[#allocation8 + $0x2f8] sm:$0xf0]  ;;  %v4160_v1 = vor.u32 %v4730_v59, %v4157_v60  ;;  %v4251_v18 = vld [vmem:[#allocation8 + $0x368] sm:$0xf] }
 0x15a   :  { %2631 = vmatpush.bf16.msra.mxu3 %v3856_v29  ;;  %2602 = vmatpush.bf16.msrb.mxu2 %v4156_v45  ;;  %v1616_v38 = vadd.f32 %v5160_v28, %v1603_v23  ;;  %v4091_v29 = vld [vmem:[#allocation8 + $0x228] sm:$0xf]  ;;  %v4093_v23 = vld [vmem:[#allocation8 + $0x238] sm:$0xf0] }
 0x15b   :  { %v4092_v42 = vor.u32 %v4716_v32, %v4091_v29  ;;  %v4219_v29 = vld [vmem:[#allocation8 + $0x328] sm:$0xf]  ;;  %v4748_v32 = vld [vmem:[#allocation8 + $0x334] sm:$0xf0] }
 0x15c   :  { %2645 = vmatpush.bf16.msra.mxu1 %v3968_v14  ;;  %v1628_v24 = vpop.f32.mrf.mxu1  ;;  %v4267_v14 = vld [vmem:[#allocation8 + $0x388] sm:$0xf] }
 0x15d   :  { %v1629_v33 = vadd.f32 %v1628_v24, %v1616_v38  ;;  %v4268_v45 = vor.u32 %v4760_v15, %v4267_v14  ;;  %v4235_v24 = vld [vmem:[#allocation8 + $0x348] sm:$0xf]  ;;  %v4780_v14 = vld [vmem:[#allocation11 + $0x38] sm:$0xff] }
 0x15e   :  { %2632 = vmatpush.bf16.msra.mxu3 %v3840_v48  ;;  %2603 = vmatpush.bf16.msrb.mxu2 %v4140_v20  ;;  %v4192_v48 = vor.u32 %v4738_v10, %v4189_v6  ;;  %v4112_v20 = vor.u32 %v4718_v17, %v4109_v62  ;;  %v4766_v10 = vld [vmem:[#allocation8 + $0x3cc] sm:$0xf]  ;;  %v4301_v6 = vld [vmem:[#allocation8 + $0x3d8] sm:$0xf0] }
 0x15f   :  { %v1667_v2 = vpop.f32.mrf.mxu0 }
 0x160   :  { %2646 = vmatpush.bf16.msra.mxu1 %v3952_v19  ;;  %v4756_v19 = vld [vmem:[#allocation8 + $0x374] sm:$0xf0] }
 0x161   :  { %2556 = vmatmul.bf16.vlgmr.msra.gmra.mxu2 %v5163_v61  ;;  %v4252_v21 = vor.u32 %v4756_v19, %v4251_v18  ;;  %v4778_v18 = vld [vmem:[#allocation11 + $0x28] sm:$0xff] }
 0x162   :  { %2633 = vmatpush.bf16.msra.mxu3 %v3824_v34  ;;  %2604 = vmatpush.bf16.msrb.mxu2 %v4124_v26  ;;  %v4752_v26 = vld [vmem:[#allocation8 + $0x354] sm:$0xf0] }
 0x163   :  { %2647 = vmatmul.bf16.vlgmr.msra.gmra.mxu1 %v5139_v7  ;;  %v4712_v7 = vld [vmem:[#allocation8 + $0x214] sm:$0xf0]  ;;  %v4236_v38 = vor.u32 %v4752_v26, %v4235_v24  ;;  %v4788_v24 = vld [vmem:[#allocation11 + $0x78] sm:$0xff] }
 0x164   :  { %v1630_v36 = vpop.f32.mrf.mxu1  ;;  %v4076_v47 = vor.u32 %v4712_v7, %v4075_v43  ;;  %v4317_v43 = vld [vmem:[#allocation8 + $0x3f8] sm:$0xf0]  ;;  %2959 = vmatpush.bf16.msrb.mxu1 %v4788_v24  ;;  %v4775_v26 = vld [vmem:[#allocation11 + $0x10] sm:$0xff] }
 0x165   :  { %2634 = vmatmul.bf16.vlgmr.msra.gmra.mxu3 %v5132_v51  ;;  %v4720_v51 = vld [vmem:[#allocation8 + $0x254] sm:$0xf0]  ;;  %v4220_v36 = vor.u32 %v4748_v32, %v4219_v29  ;;  %v1825_v32 = vperm.slane %v5178_v57, 3 }
 0x166   :  { %v4108_v31 = vor.u32 %v4720_v51, %v4107_v27  ;;  %v4096_v51 = vor.u32 %v4714_v22, %v4093_v23  ;;  %2946 = vmatpush.bf16.msrb.mxu3 %v4780_v14  ;;  %v4776_v23 = vld [vmem:[#allocation11 + $0x18] sm:$0xff]  ;;  %v4798_v14 = vld [vmem:[#allocation11 + $0xc8] sm:$0xff] }
 0x167   :  { %v1654_v41 = vpop.f32.mrf.mxu2  ;;  %v1669_v28 = vpop.f32.mrf.mxu0 }
 0x168   :  { %v1641_v39 = vpop.f32.mrf.mxu3  ;;  %2605 = vmatpush.bf16.msrb.mxu2 %v4108_v31  ;;  %v4077_v31 = vld [vmem:[#allocation8 + $0x218] sm:$0xf0]  ;;  %v4304_v28 = vor.u32 %v4766_v10, %v4301_v6  ;;  %v4782_v10 = vld [vmem:[#allocation11 + $0x48] sm:$0xff] }
 0x169   :  { %v1642_v40 = vadd.f32 %v1641_v39, %v1629_v33  ;;  %v4203_v39 = vld [vmem:[#allocation8 + $0x308] sm:$0xf]  ;;  %v4794_v6 = vld [vmem:[#allocation11 + $0xa8] sm:$0xff] }
 0x16b   :  { %v1655_v16 = vadd.f32 %v1654_v41, %v1642_v40  ;;  %v4744_v40 = vld [vmem:[#allocation8 + $0x314] sm:$0xf0] }
 0x16c   :  { %2606 = vmatpush.bf16.msrb.mxu2 %v4092_v42  ;;  %v1680_v49 = vpop.f32.mrf.mxu1  ;;  %v4770_v42 = vld [vmem:[#allocation8 + $0x3ec] sm:$0xf]  ;;  %v4204_v7 = vor.u32 %v4744_v40, %v4203_v39 }
 0x16d   :  { %v1668_v44 = vadd.f32 %v1667_v2, %v1655_v16  ;;  %v4710_v2 = vld [vmem:[#allocation8 + $0x20c] sm:$0xf]  ;;  %v4320_v16 = vor.u32 %v4770_v42, %v4317_v43  ;;  %v4795_v42 = vld [vmem:[#allocation11 + $0xb0] sm:$0xff] }
 0x16e   :  { %v4080_v33 = vor.u32 %v4710_v2, %v4077_v31  ;;  %v4773_v2 = vld [vmem:[#allocation11] sm:$0xff] }
 0x16f   :  { %v1681_v52 = vadd.f32 %v1680_v49, %v1668_v44  ;;  %v1656_v30 = vpop.f32.mrf.mxu2  ;;  %v4762_v44 = vld [vmem:[#allocation8 + $0x3ac] sm:$0xf]  ;;  %v4785_v31 = vld [vmem:[#allocation11 + $0x60] sm:$0xff] }
 0x170   :  { %v1643_v53 = vpop.f32.mrf.mxu3  ;;  %2607 = vmatpush.bf16.msrb.mxu2 %v4076_v47  ;;  %v4285_v47 = vld [vmem:[#allocation8 + $0x3b8] sm:$0xf0]  ;;  %v4758_v49 = vld [vmem:[#allocation8 + $0x38c] sm:$0xf] }
 0x171   :  { %v1687_v56 = vmax.f32 %v1681_v52, 0.0  ;;  %v4272_v52 = vor.u32 %v4758_v49, %v4269_v50  ;;  %v1822_v53 = vperm.slane %v5178_v57, 0  ;;  %v4792_v50 = vld [vmem:[#allocation11 + $0x98] sm:$0xff] }
 0x173   :  { %v5171_v34 = vpack.c.bf16 %v1687_v56, %v1687_v56  ;;  %2608 = vmatmul.bf16.vlgmr.msrb.gmra.mxu2 %v5163_v61  ;;  %v4750_v56 = vld [vmem:[#allocation8 + $0x34c] sm:$0xf] }
 0x174   :  { %2652 = vmatpush.bf16.msra.mxu2 %v4192_v48  ;;  %v1682_v3 = vpop.f32.mrf.mxu1  ;;  %v4288_v48 = vor.u32 %v4762_v44, %v4285_v47  ;;  %v4781_v44 = vld [vmem:[#allocation11 + $0x40] sm:$0xff] }
 0x175   :  { %2517 = vmatmul.bf16.vlgmr.msrb.gmra.mxu0 %v5171_v34  ;;  %v4793_v47 = vld [vmem:[#allocation11 + $0xa0] sm:$0xff] }
 0x176   :  { %2613 = vmatpush.bf16.msrb.mxu0 %v4316_v58 }
 0x178   :  { %2653 = vmatpush.bf16.msra.mxu2 %v4176_v35  ;;  %v4237_v35 = vld [vmem:[#allocation8 + $0x358] sm:$0xf0] }
 0x179   :  { %v4240_v63 = vor.u32 %v4750_v56, %v4237_v35  ;;  %v4789_v56 = vld [vmem:[#allocation11 + $0x80] sm:$0xff]  ;;  %v4804_v35 = vld [vmem:[#allocation11 + $0xf8] sm:$0xff] }
 0x17a   :  { %2614 = vmatpush.bf16.msrb.mxu0 %v4300_v4  ;;  %v4742_v4 = vld [vmem:[#allocation8 + $0x30c] sm:$0xf] }
 0x17b   :  { %v4208_v8 = vor.u32 %v4742_v4, %v4205_v5  ;;  %v4801_v4 = vld [vmem:[#allocation11 + $0xe0] sm:$0xff] }
 0x17c   :  { %2654 = vmatpush.bf16.msra.mxu2 %v4160_v1  ;;  %v4221_v1 = vld [vmem:[#allocation8 + $0x338] sm:$0xf0] }
 0x17d   :  { %v4224_v3 = vor.u32 %v4746_v0, %v4221_v1  ;;  %v4802_v1 = vld [vmem:[#allocation11 + $0xe8] sm:$0xff] }
 0x17e   :  { %2615 = vmatpush.bf16.msrb.mxu0 %v4284_v11 }
 0x180   :  { %2655 = vmatpush.bf16.msra.mxu2 %v4144_v9  ;;  %v1823_v9 = vperm.slane %v5178_v57, 1 }
 0x182   :  { %2616 = vmatpush.bf16.msrb.mxu0 %v4268_v45  ;;  %v4779_v45 = vld [vmem:[#allocation11 + $0x30] sm:$0xff] }
 0x183   :  { %2947 = vmatpush.bf16.msrb.mxu3 %v4779_v45 }
 0x184   :  { %2656 = vmatpush.bf16.msra.mxu2 %v4128_v55  ;;  %v1824_v55 = vperm.slane %v5178_v57, 2  ;;  %v4791_v57 = vld [vmem:[#allocation11 + $0x90] sm:$0xff] }
 0x185   :  { %2569 = vmatmul.bf16.vlgmr.msra.gmra.mxu0 %v5171_v34 }
 0x186   :  { %2617 = vmatpush.bf16.msrb.mxu0 %v4252_v21  ;;  %v4777_v21 = vld [vmem:[#allocation11 + $0x20] sm:$0xff] }
 0x187   :  { %2948 = vmatpush.bf16.msrb.mxu3 %v4778_v18 }
 0x188   :  { %v2479_v27 = vpop.f32.mrf.mxu3  ;;  %2657 = vmatpush.bf16.msra.mxu2 %v4112_v20 }
 0x189   :  { %v2480_v30 = vadd.f32 %v2479_v27, %v1822_v53  ;;  %v4787_v27 = vld [vmem:[#allocation11 + $0x70] sm:$0xff] }
 0x18a   :  { %2618 = vmatpush.bf16.msrb.mxu0 %v4236_v38  ;;  %2960 = vmatpush.bf16.msrb.mxu1 %v4787_v27  ;;  %v4786_v38 = vld [vmem:[#allocation11 + $0x68] sm:$0xff] }
 0x18b   :  { %2949 = vmatpush.bf16.msrb.mxu3 %v4777_v21 }
 0x18c   :  { %2658 = vmatpush.bf16.msra.mxu2 %v4096_v51  ;;  %v4774_v51 = vld [vmem:[#allocation11 + $0x8] sm:$0xff] }
 0x18e   :  { %2619 = vmatpush.bf16.msrb.mxu0 %v4220_v36  ;;  %2961 = vmatpush.bf16.msrb.mxu1 %v4786_v38  ;;  %v4796_v36 = vld [vmem:[#allocation11 + $0xb8] sm:$0xff] }
 0x18f   :  { %2950 = vmatpush.bf16.msrb.mxu3 %v4776_v23 }
 0x190   :  { %v2481_v41 = vpop.f32.mrf.mxu3  ;;  %2659 = vmatpush.bf16.msra.mxu2 %v4080_v33  ;;  %v4784_v33 = vld [vmem:[#allocation11 + $0x58] sm:$0xff] }
 0x191   :  { %v4783_v41 = vld [vmem:[#allocation11 + $0x50] sm:$0xff] }
 0x192   :  { %2620 = vmatpush.bf16.msrb.mxu0 %v4204_v7  ;;  %2962 = vmatpush.bf16.msrb.mxu1 %v4785_v31 }
 0x193   :  { %2660 = vmatmul.bf16.vlgmr.msra.gmra.mxu2 %v5163_v61  ;;  %v4754_v61 = vld [vmem:[#allocation8 + $0x36c] sm:$0xf]  ;;  %2951 = vmatpush.bf16.msrb.mxu3 %v4775_v26 }
 0x194   :  { %v4256_v54 = vor.u32 %v4754_v61, %v4253_v25  ;;  %2972 = vmatpush.bf16.msrb.mxu2 %v4796_v36  ;;  %v4790_v61 = vld [vmem:[#allocation11 + $0x88] sm:$0xff] }
 0x195   :  { %2621 = vmatmul.bf16.vlgmr.msrb.gmra.mxu0 %v5171_v34 }
 0x196   :  { %2665 = vmatpush.bf16.msra.mxu0 %v4320_v16  ;;  %2963 = vmatpush.bf16.msrb.mxu1 %v4784_v33 }
 0x197   :  { %2952 = vmatpush.bf16.msrb.mxu3 %v4774_v51 }
 0x198   :  { %v2492_v58 = vpop.f32.mrf.mxu1  ;;  %2973 = vmatpush.bf16.msrb.mxu2 %v4795_v42 }
 0x199   :  { %v5181_v60 = vadd.f32 %v2492_v58, %v2480_v30 }
 0x19a   :  { %2666 = vmatpush.bf16.msra.mxu0 %v4304_v28  ;;  %2964 = vmatpush.bf16.msrb.mxu1 %v4783_v41 }
 0x19b   :  { %2953 = vmatpush.bf16.msrb.mxu3 %v4773_v2 }
 0x19c   :  { %2974 = vmatpush.bf16.msrb.mxu2 %v4794_v6 }
 0x19e   :  { %2667 = vmatpush.bf16.msra.mxu0 %v4288_v48  ;;  %2965 = vmatpush.bf16.msrb.mxu1 %v4782_v10 }
 0x1a0   :  { %v2494_v46 = vpop.f32.mrf.mxu1  ;;  %2975 = vmatpush.bf16.msrb.mxu2 %v4793_v47 }
 0x1a2   :  { %2668 = vmatpush.bf16.msra.mxu0 %v4272_v52  ;;  %2966 = vmatpush.bf16.msrb.mxu1 %v4781_v44 }
 0x1a4   :  { %2976 = vmatpush.bf16.msrb.mxu2 %v4792_v50 }
 0x1a6   :  { %2669 = vmatpush.bf16.msra.mxu0 %v4256_v54 }
 0x1a8   :  { %v2531_v59 = vpop.f32.mrf.mxu3  ;;  %v2544_v12 = vpop.f32.mrf.mxu1  ;;  %2977 = vmatpush.bf16.msrb.mxu2 %v4791_v57 }
 0x1a9   :  { %v2532_v11 = vadd.f32 %v2531_v59, %v1823_v9 }
 0x1aa   :  { %2670 = vmatpush.bf16.msra.mxu0 %v4240_v63  ;;  %v4803_v63 = vld [vmem:[#allocation11 + $0xf0] sm:$0xff] }
 0x1ab   :  { %v5184_v13 = vadd.f32 %v2544_v12, %v2532_v11  ;;  %v4799_v11 = vld [vmem:[#allocation11 + $0xd0] sm:$0xff] }
 0x1ac   :  { %2978 = vmatpush.bf16.msrb.mxu2 %v4790_v61 }
 0x1ae   :  { %2671 = vmatpush.bf16.msra.mxu0 %v4224_v3 }
 0x1b0   :  { %v2533_v37 = vpop.f32.mrf.mxu3  ;;  %v2546_v15 = vpop.f32.mrf.mxu1  ;;  %2979 = vmatpush.bf16.msrb.mxu2 %v4789_v56 }
 0x1b1   :  { %v4800_v37 = vld [vmem:[#allocation11 + $0xd8] sm:$0xff] }
 0x1b2   :  { %2672 = vmatpush.bf16.msra.mxu0 %v4208_v8 }
 0x1b5   :  { %2673 = vmatmul.bf16.vlgmr.msra.gmra.mxu0 %v5171_v34 }
 0x1b6   :  { %2985 = vmatpush.bf16.msrb.mxu0 %v4804_v35 }
 0x1ba   :  { %2986 = vmatpush.bf16.msrb.mxu0 %v4803_v63 }
 0x1be   :  { %2987 = vmatpush.bf16.msrb.mxu0 %v4802_v1 }
 0x1c0   :  { %v2596_v19 = vpop.f32.mrf.mxu1 }
 0x1c2   :  { %2988 = vmatpush.bf16.msrb.mxu0 %v4801_v4 }
 0x1c6   :  { %2989 = vmatpush.bf16.msrb.mxu0 %v4800_v37 }
 0x1c8   :  { %v2583_v17 = vpop.f32.mrf.mxu3  ;;  %v2598_v34 = vpop.f32.mrf.mxu1 }
 0x1c9   :  { %v2584_v62 = vadd.f32 %v2583_v17, %v1824_v55  ;;  %v4797_v55 = vld [vmem:[#allocation11 + $0xc0] sm:$0xff] }
 0x1ca   :  { %2990 = vmatpush.bf16.msrb.mxu0 %v4799_v11 }
 0x1cb   :  { %v5188_v20 = vadd.f32 %v2596_v19, %v2584_v62 }
 0x1ce   :  { %2991 = vmatpush.bf16.msrb.mxu0 %v4798_v14 }
 0x1d0   :  { %v2585_v22 = vpop.f32.mrf.mxu3 }
 0x1d2   :  { %2992 = vmatpush.bf16.msrb.mxu0 %v4797_v55 }
 0x1d4   :  { %v2505_v29 = vpop.f32.mrf.mxu2 }
 0x1d5   :  { %v2506_v53 = vadd.f32 %v2505_v29, %v5181_v60 }
 0x1dc   :  { %v2507_v7 = vpop.f32.mrf.mxu2 }
 0x1e0   :  { %v2648_v43 = vpop.f32.mrf.mxu1 }
 0x1e4   :  { %v2557_v49 = vpop.f32.mrf.mxu2 }
 0x1e5   :  { %v2558_v60 = vadd.f32 %v2557_v49, %v5184_v13 }
 0x1e8   :  { %v2635_v39 = vpop.f32.mrf.mxu3  ;;  %v2650_v48 = vpop.f32.mrf.mxu1 }
 0x1e9   :  { %v2636_v40 = vadd.f32 %v2635_v39, %v1825_v32  ;;  %v4816_v32 = vld [vmem:[%s5209_s6] ss:$0 sm:$0xff] }
 0x1eb   :  { %v5191_v16 = vadd.f32 %v2648_v43, %v2636_v40 }
 0x1ec   :  { %v2559_v52 = vpop.f32.mrf.mxu2 }
 0x1f0   :  { %v2637_v28 = vpop.f32.mrf.mxu3 }
 0x1f2   :  { %v2518_v25 = vpop.f32.mrf.mxu0 }
 0x1f3   :  { %v2519_v54 = vadd.f32 %v2518_v25, %v2506_v53 }
 0x1f5   :  { %v2678_v30 = vmax.f32 %v2519_v54, 0.0 }
 0x1f6   :  { %v2609_v58 = vpop.f32.mrf.mxu2 }
 0x1f7   :  { %v2682_v59 = vpack.c.bf16 %v2678_v30, %v2678_v30  ;;  %v2610_v15 = vadd.f32 %v2609_v58, %v5188_v20 }
 0x1f9   :  { %2954 = vmatmul.bf16.vlgmr.msrb.gmra.mxu3 %v2682_v59 }
 0x1fa   :  { %v2520_v0 = vpop.f32.mrf.mxu0 }
 0x1fe   :  { %v2611_v3 = vpop.f32.mrf.mxu2 }
 0x202   :  { %v2570_v5 = vpop.f32.mrf.mxu0 }
 0x203   :  { %v2571_v46 = vadd.f32 %v2570_v5, %v2558_v60 }
 0x205   :  { %v2679_v8 = vmax.f32 %v2571_v46, 0.0 }
 0x207   :  { %v2683_v9 = vpack.c.bf16 %v2679_v8, %v2679_v8 }
 0x209   :  { %2967 = vmatmul.bf16.vlgmr.msrb.gmra.mxu1 %v2683_v9 }
 0x20a   :  { %v2572_v12 = vpop.f32.mrf.mxu0 }
 0x212   :  { %v2622_v45 = vpop.f32.mrf.mxu0 }
 0x213   :  { %v2623_v17 = vadd.f32 %v2622_v45, %v2610_v15 }
 0x215   :  { %v2680_v13 = vmax.f32 %v2623_v17, 0.0 }
 0x216   :  { %v2661_v62 = vpop.f32.mrf.mxu2 }
 0x217   :  { %v2684_v18 = vpack.c.bf16 %v2680_v13, %v2680_v13  ;;  %v2662_v22 = vadd.f32 %v2661_v62, %v5191_v16 }
 0x219   :  { %2980 = vmatmul.bf16.vlgmr.msrb.gmra.mxu2 %v2684_v18 }
 0x21a   :  { %v2624_v19 = vpop.f32.mrf.mxu0 }
 0x21e   :  { %v2663_v21 = vpop.f32.mrf.mxu2 }
 0x232   :  { %v2674_v23 = vpop.f32.mrf.mxu0 }
 0x233   :  { %v2675_v24 = vadd.f32 %v2674_v23, %v2662_v22 }
 0x235   :  { %v2681_v34 = vmax.f32 %v2675_v24, 0.0 }
 0x237   :  { %v2685_v26 = vpack.c.bf16 %v2681_v34, %v2681_v34 }
 0x239   :  { %2993 = vmatmul.bf16.vlgmr.msrb.gmra.mxu0 %v2685_v26 }
 0x23a   :  { %v2676_v27 = vpop.f32.mrf.mxu0 }
 0x27c   :  { %v2955_v51 = vpop.f32.mrf.mxu3 }
 0x27d   :  { %v2956_v33 = vadd.f32 %v4816_v32, %v2955_v51 }
 0x284   :  { %v2957_v20 = vpop.f32.mrf.mxu3 }
 0x286   :  { %v2968_v38 = vpop.f32.mrf.mxu1 }
 0x287   :  { %v2969_v36 = vadd.f32 %v2968_v38, %v2956_v33 }
 0x28e   :  { %v2970_v2 = vpop.f32.mrf.mxu1 }
 0x29c   :  { %v2981_v31 = vpop.f32.mrf.mxu2 }
 0x29d   :  { %v2982_v39 = vadd.f32 %v2981_v31, %v2969_v36 }
 0x2a4   :  { %v2983_v29 = vpop.f32.mrf.mxu2 }
 0x2b6   :  { %v2994_v40 = vpop.f32.mrf.mxu0 }
 0x2b7   :  { %v2995_v41 = vadd.f32 %v2994_v40, %v2982_v39 }
 0x2b9   :  { %v2998_v42 = vmax.f32 %v2995_v41, 0.0 }
 0x2bb   :  { %v2999_v43 = vpack.c.bf16 %v2998_v42, %v2998_v42 }
 0x2bd   :  { %3000 = vst [vmem:[#allocation13] sm:$0xf] %v2999_v43 }
 0x2be   :  { %v2996_v7 = vpop.f32.mrf.mxu0  ;;  %3011 = dma.vmem_to_hbm [thread:$0]  %s3007_s9, 64, %s3009_s12, [#allocation4]  }
 0x2bf   :  { %4993 = dma.done.wait [#allocation4], 64  }
 0x2c0   :  { %4994 = vsyncadd [#allocation4], 4294967232 }
 0x2c1   :  { %3016 = vsyncpa [#allocation3], 1 }
 0x2c2   :  { %3017 = vsyncpa [#allocation6], 1 }
 0x2c3   :  { %3018 = vsyncpa [#allocation9], 1 }
 0x2c4   :  { %3019 = vsyncpa [#allocation12], 1 }
 0x2c5   :  { %3020 = vsyncpa [#allocation4], 1 }

</bundles_post_ra>
